<compile_context>
chip_gen: v7x
topology: tpu7x:2x2x1
jax: 0.10.0
libtpu: 0.0.40
codegen_flags: <defaults>
</compile_context>

<pallas_src>
import numpy as np
import jax
import jax.numpy as jnp
from jax.experimental import pallas as pl
from jax.experimental.pallas import tpu as pltpu


BRANCH_DIMS = [(5, 64), (64, 128), (128, 256), (256, 128), (128, 64)]
HEAD_DIMS = [(128, 128), (128, 32), (32, 1)]
_BR_OFF = [0, 64, 192, 448, 576]      # bias lane offsets inside the (1, 640) branch bias slab
_HD_OFF = [0, 128, 160]               # bias lane offsets inside the (1, 161) head bias slab


# ----------------------------- Pallas kernel ------------------------------

def _leaky(h):
    # LeakyReLU(0.2): max(h, 0.2*h) == where(h >= 0, h, 0.2*h), but only mul+max on the VPU.
    return jnp.maximum(h, 0.2 * h)


def _branch(x, w_refs, b_ref):
    h = x
    n = len(w_refs)
    for i, w_ref in enumerate(w_refs):
        co = BRANCH_DIMS[i][1]
        o = _BR_OFF[i]
        h = jnp.dot(h, w_ref[...], preferred_element_type=jnp.float32) + b_ref[:, o:o + co]
        if i < n - 1:
            h = _leaky(h)
    return h


def disc_poseeye_kernel(x1_ref, x2_ref,
                        w10, w11, w12, w13, w14, b1_ref,
                        w20, w21, w22, w23, w24, b2_ref,
                        w3a, w3b, w31, w3c, b3_ref,
                        out_ref):
    h1 = _branch(x1_ref[...], (w10, w11, w12, w13, w14), b1_ref)   # (TB, 64)
    h2 = _branch(x2_ref[...], (w20, w21, w22, w23, w24), b2_ref)   # (TB, 64)

    # Head layer 0 without the lane-axis concat:
    #   cat(h1, h2, axis=1) @ W3_0 == h1 @ W3_0[:64] + h2 @ W3_0[64:]
    h = (jnp.dot(h1, w3a[...], preferred_element_type=jnp.float32)
         + jnp.dot(h2, w3b[...], preferred_element_type=jnp.float32)
         + b3_ref[:, _HD_OFF[0]:_HD_OFF[0] + 128])
    h = _leaky(h)

    h = (jnp.dot(h, w31[...], preferred_element_type=jnp.float32)
         + b3_ref[:, _HD_OFF[1]:_HD_OFF[1] + 32])
    h = _leaky(h)

    # Final 32 -> 1 layer: broadcast-multiply + lane reduction on the VPU/XLU instead of an
    # N=1 MXU matmul (which would use 1/128 of the MXU columns).
    y = jnp.sum(h * w3c[...], axis=-1, keepdims=True) + b3_ref[:, _HD_OFF[2]:_HD_OFF[2] + 1]
    out_ref[...] = y.astype(out_ref.dtype)


# ------------------------------ host wrapper -------------------------------

def discriminator_poseeye_forward(x1, x2, packed, *, tb=256):
    """Fused forward pass. x1, x2: (B, 5) float32. Returns (B, 1) float32."""
    B = x1.shape[0]
    assert x1.shape == (B, 5) and x2.shape == (B, 5)
    assert tb % 8 == 0

    TB = B if B <= tb else tb
    Bp = pl.cdiv(B, TB) * TB
    if Bp != B:  # pad the batch so the last block is never out-of-range
        x1 = jnp.pad(x1, ((0, Bp - B), (0, 0)))
        x2 = jnp.pad(x2, ((0, Bp - B), (0, 0)))
    grid = (Bp // TB,)

    flat = (list(packed["w1"]) + [packed["b1"]]
            + list(packed["w2"]) + [packed["b2"]]
            + [packed["w3a"], packed["w3b"], packed["w31"], packed["w3c"], packed["b3"]])

    x_spec = pl.BlockSpec((TB, 5), lambda i: (i, 0))
    # Constant index_map -> weights/biases DMA'd once and kept resident across grid steps.
    def pin(a):
        return pl.BlockSpec(a.shape, lambda i: (0, 0))

    out = pl.pallas_call(
        disc_poseeye_kernel,
        out_shape=jax.ShapeDtypeStruct((Bp, 1), jnp.float32),
        grid=grid,
        in_specs=[x_spec, x_spec] + [pin(a) for a in flat],
        out_specs=pl.BlockSpec((TB, 1), lambda i: (i, 0)),
        compiler_params=pltpu.CompilerParams(
            dimension_semantics=("parallel",),
            vmem_limit_bytes=32 * 1024 * 1024,
        ),
    )(x1, x2, *flat)
    return out[:B]


# ------------------------------ params ------------------------------

def make_raw_params(key):
    """Per-layer (W:(in,out), b:(out,)) parameters mirroring the PyTorch module."""
    def linear(k, cin, cout):
        kw, kb = jax.random.split(k)
        w = 0.1 * jax.random.normal(kw, (cin, cout), jnp.float32)
        b = 0.1 * jax.random.normal(kb, (cout,), jnp.float32)
        return w, b

    n = 2 * len(BRANCH_DIMS) + len(HEAD_DIMS)
    keys = iter(jax.random.split(key, n))
    return {
        "layers1": [linear(next(keys), ci, co) for ci, co in BRANCH_DIMS],
        "layers2": [linear(next(keys), ci, co) for ci, co in BRANCH_DIMS],
        "layers3": [linear(next(keys), ci, co) for ci, co in HEAD_DIMS],
    }


def pack_params(raw):
    """Kernel layout: weights (in,out); per-group bias slabs; head-0 weight split in two
    (64,128) halves; final (32,1) weight stored as a (1,32) row."""
    def bias_slab(layers):
        return jnp.concatenate([b.reshape(1, -1) for _, b in layers], axis=1)

    w30, w31, w32 = (w for w, _ in raw["layers3"])
    return dict(
        w1=[w for w, _ in raw["layers1"]], b1=bias_slab(raw["layers1"]),   # b1: (1, 640)
        w2=[w for w, _ in raw["layers2"]], b2=bias_slab(raw["layers2"]),   # b2: (1, 640)
        w3a=w30[:64, :], w3b=w30[64:, :], w31=w31,
        w3c=w32.reshape(1, -1),                                            # (1, 32)
        b3=bias_slab(raw["layers3"]),                                      # (1, 161)
    )


# ------------------------------ pure-JAX reference ------------------------------

def _ref_forward(x1, x2, raw):
    def mlp(x, layers):
        n = len(layers)
        for i, (w, b) in enumerate(layers):
            x = x @ w + b
            if i < n - 1:
                x = jnp.where(x >= 0.0, x, 0.2 * x)
        return x

    h1 = mlp(x1, raw["layers1"])
    h2 = mlp(x2, raw["layers2"])
    return mlp(jnp.concatenate([h1, h2], axis=1), raw["layers3"])


# ----------------------------------- main -----------------------------------

if __name__ == "__main__":
    key = jax.random.PRNGKey(0)
    kp, k1, k2 = jax.random.split(key, 3)
    raw = make_raw_params(kp)
    packed = pack_params(raw)

    B = 200  # not a multiple of the tile -> exercises the padded-remainder path
    x1 = jax.random.normal(k1, (B, 5), jnp.float32)
    x2 = jax.random.normal(k2, (B, 5), jnp.float32)

    out = discriminator_poseeye_forward(x1, x2, packed, tb=64)   # grid = (4,), TB = 64
    out = jax.block_until_ready(out)
    assert out.shape == (B, 1), out.shape

    ref = jax.block_until_ready(_ref_forward(x1, x2, raw))
    np.testing.assert_allclose(np.asarray(out), np.asarray(ref), rtol=1e-3, atol=1e-3)

    print("KERNEL_OK")
</pallas_src>

<mosaic_0001>
module attributes {stable_mosaic.version = 11 : i64} {
  func.func @disc_poseeye_kernel(%arg0: i32, %arg1: memref<64x5xf32, #tpu.memory_space<vmem>>, %arg2: memref<64x5xf32, #tpu.memory_space<vmem>>, %arg3: memref<5x64xf32, #tpu.memory_space<vmem>>, %arg4: memref<64x128xf32, #tpu.memory_space<vmem>>, %arg5: memref<128x256xf32, #tpu.memory_space<vmem>>, %arg6: memref<256x128xf32, #tpu.memory_space<vmem>>, %arg7: memref<128x64xf32, #tpu.memory_space<vmem>>, %arg8: memref<1x640xf32, #tpu.memory_space<vmem>>, %arg9: memref<5x64xf32, #tpu.memory_space<vmem>>, %arg10: memref<64x128xf32, #tpu.memory_space<vmem>>, %arg11: memref<128x256xf32, #tpu.memory_space<vmem>>, %arg12: memref<256x128xf32, #tpu.memory_space<vmem>>, %arg13: memref<128x64xf32, #tpu.memory_space<vmem>>, %arg14: memref<1x640xf32, #tpu.memory_space<vmem>>, %arg15: memref<64x128xf32, #tpu.memory_space<vmem>>, %arg16: memref<64x128xf32, #tpu.memory_space<vmem>>, %arg17: memref<128x32xf32, #tpu.memory_space<vmem>>, %arg18: memref<1x32xf32, #tpu.memory_space<vmem>>, %arg19: memref<1x161xf32, #tpu.memory_space<vmem>>, %arg20: memref<64x1xf32, #tpu.memory_space<vmem>>) attributes {dimension_semantics = [#tpu.dimension_semantics<parallel>], iteration_bounds = array<i64: 4>, scalar_prefetch = 0 : i64, scratch_operands = 0 : i64, tpu.core_type = #tpu.core_type<tc>, window_params = [{transform_indices = @transform_0, window_bounds = array<i64: 64, 5>}, {transform_indices = @transform_1, window_bounds = array<i64: 64, 5>}, {pipeline_mode = #tpu.pipeline_mode<synchronous>, transform_indices = @transform_2, window_bounds = array<i64: 5, 64>}, {pipeline_mode = #tpu.pipeline_mode<synchronous>, transform_indices = @transform_3, window_bounds = array<i64: 64, 128>}, {pipeline_mode = #tpu.pipeline_mode<synchronous>, transform_indices = @transform_4, window_bounds = array<i64: 128, 256>}, {pipeline_mode = #tpu.pipeline_mode<synchronous>, transform_indices = @transform_5, window_bounds = array<i64: 256, 128>}, {pipeline_mode = #tpu.pipeline_mode<synchronous>, transform_indices = @transform_6, window_bounds = array<i64: 128, 64>}, {pipeline_mode = #tpu.pipeline_mode<synchronous>, transform_indices = @transform_7, window_bounds = array<i64: 1, 640>}, {pipeline_mode = #tpu.pipeline_mode<synchronous>, transform_indices = @transform_8, window_bounds = array<i64: 5, 64>}, {pipeline_mode = #tpu.pipeline_mode<synchronous>, transform_indices = @transform_9, window_bounds = array<i64: 64, 128>}, {pipeline_mode = #tpu.pipeline_mode<synchronous>, transform_indices = @transform_10, window_bounds = array<i64: 128, 256>}, {pipeline_mode = #tpu.pipeline_mode<synchronous>, transform_indices = @transform_11, window_bounds = array<i64: 256, 128>}, {pipeline_mode = #tpu.pipeline_mode<synchronous>, transform_indices = @transform_12, window_bounds = array<i64: 128, 64>}, {pipeline_mode = #tpu.pipeline_mode<synchronous>, transform_indices = @transform_13, window_bounds = array<i64: 1, 640>}, {pipeline_mode = #tpu.pipeline_mode<synchronous>, transform_indices = @transform_14, window_bounds = array<i64: 64, 128>}, {pipeline_mode = #tpu.pipeline_mode<synchronous>, transform_indices = @transform_15, window_bounds = array<i64: 64, 128>}, {pipeline_mode = #tpu.pipeline_mode<synchronous>, transform_indices = @transform_16, window_bounds = array<i64: 128, 32>}, {pipeline_mode = #tpu.pipeline_mode<synchronous>, transform_indices = @transform_17, window_bounds = array<i64: 1, 32>}, {pipeline_mode = #tpu.pipeline_mode<synchronous>, transform_indices = @transform_18, window_bounds = array<i64: 1, 161>}, {transform_indices = @transform_19, window_bounds = array<i64: 64, 1>}]} {
    %c0 = arith.constant 0 : index
    %c0_0 = arith.constant 0 : index
    %0 = vector.load %arg1[%c0, %c0_0] : memref<64x5xf32, #tpu.memory_space<vmem>>, vector<64x5xf32>
    %c0_1 = arith.constant 0 : index
    %c0_2 = arith.constant 0 : index
    %1 = vector.load %arg3[%c0_1, %c0_2] : memref<5x64xf32, #tpu.memory_space<vmem>>, vector<5x64xf32>
    %cst = arith.constant dense<0.000000e+00> : vector<64x64xf32>
    %2 = tpu.matmul %0, %1, %cst {dimension_numbers = #tpu.dot_dimension_numbers<[1], [0], [0], [1], [0, 0, 1, 1], [], []>} : vector<64x5xf32>, vector<5x64xf32>, vector<64x64xf32> -> vector<64x64xf32>
    %c0_3 = arith.constant 0 : index
    %c0_4 = arith.constant 0 : index
    %3 = vector.load %arg8[%c0_3, %c0_4] : memref<1x640xf32, #tpu.memory_space<vmem>>, vector<1x64xf32>
    %4 = vector.broadcast %3 : vector<1x64xf32> to vector<64x64xf32>
    %5 = arith.addf %2, %4 : vector<64x64xf32>
    %cst_5 = arith.constant 2.000000e-01 : f32
    %6 = vector.broadcast %cst_5 : f32 to vector<64x64xf32>
    %7 = arith.mulf %6, %5 : vector<64x64xf32>
    %8 = arith.maximumf %5, %7 : vector<64x64xf32>
    %c0_6 = arith.constant 0 : index
    %c0_7 = arith.constant 0 : index
    %9 = vector.load %arg4[%c0_6, %c0_7] : memref<64x128xf32, #tpu.memory_space<vmem>>, vector<64x128xf32>
    %cst_8 = arith.constant dense<0.000000e+00> : vector<64x128xf32>
    %10 = tpu.matmul %8, %9, %cst_8 {dimension_numbers = #tpu.dot_dimension_numbers<[1], [0], [0], [1], [0, 0, 1, 1], [], []>} : vector<64x64xf32>, vector<64x128xf32>, vector<64x128xf32> -> vector<64x128xf32>
    %c0_9 = arith.constant 0 : index
    %c64 = arith.constant 64 : index
    %11 = vector.load %arg8[%c0_9, %c64] : memref<1x640xf32, #tpu.memory_space<vmem>>, vector<1x128xf32>
    %12 = vector.broadcast %11 : vector<1x128xf32> to vector<64x128xf32>
    %13 = arith.addf %10, %12 : vector<64x128xf32>
    %cst_10 = arith.constant 2.000000e-01 : f32
    %14 = vector.broadcast %cst_10 : f32 to vector<64x128xf32>
    %15 = arith.mulf %14, %13 : vector<64x128xf32>
    %16 = arith.maximumf %13, %15 : vector<64x128xf32>
    %c0_11 = arith.constant 0 : index
    %c0_12 = arith.constant 0 : index
    %17 = vector.load %arg5[%c0_11, %c0_12] : memref<128x256xf32, #tpu.memory_space<vmem>>, vector<128x256xf32>
    %cst_13 = arith.constant dense<0.000000e+00> : vector<64x256xf32>
    %18 = tpu.matmul %16, %17, %cst_13 {dimension_numbers = #tpu.dot_dimension_numbers<[1], [0], [0], [1], [0, 0, 1, 1], [], []>} : vector<64x128xf32>, vector<128x256xf32>, vector<64x256xf32> -> vector<64x256xf32>
    %c0_14 = arith.constant 0 : index
    %c192 = arith.constant 192 : index
    %19 = vector.load %arg8[%c0_14, %c192] : memref<1x640xf32, #tpu.memory_space<vmem>>, vector<1x256xf32>
    %20 = vector.broadcast %19 : vector<1x256xf32> to vector<64x256xf32>
    %21 = arith.addf %18, %20 : vector<64x256xf32>
    %cst_15 = arith.constant 2.000000e-01 : f32
    %22 = vector.broadcast %cst_15 : f32 to vector<64x256xf32>
    %23 = arith.mulf %22, %21 : vector<64x256xf32>
    %24 = arith.maximumf %21, %23 : vector<64x256xf32>
    %c0_16 = arith.constant 0 : index
    %c0_17 = arith.constant 0 : index
    %25 = vector.load %arg6[%c0_16, %c0_17] : memref<256x128xf32, #tpu.memory_space<vmem>>, vector<256x128xf32>
    %cst_18 = arith.constant dense<0.000000e+00> : vector<64x128xf32>
    %26 = tpu.matmul %24, %25, %cst_18 {dimension_numbers = #tpu.dot_dimension_numbers<[1], [0], [0], [1], [0, 0, 1, 1], [], []>} : vector<64x256xf32>, vector<256x128xf32>, vector<64x128xf32> -> vector<64x128xf32>
    %c0_19 = arith.constant 0 : index
    %c448 = arith.constant 448 : index
    %27 = vector.load %arg8[%c0_19, %c448] : memref<1x640xf32, #tpu.memory_space<vmem>>, vector<1x128xf32>
    %28 = vector.broadcast %27 : vector<1x128xf32> to vector<64x128xf32>
    %29 = arith.addf %26, %28 : vector<64x128xf32>
    %cst_20 = arith.constant 2.000000e-01 : f32
    %30 = vector.broadcast %cst_20 : f32 to vector<64x128xf32>
    %31 = arith.mulf %30, %29 : vector<64x128xf32>
    %32 = arith.maximumf %29, %31 : vector<64x128xf32>
    %c0_21 = arith.constant 0 : index
    %c0_22 = arith.constant 0 : index
    %33 = vector.load %arg7[%c0_21, %c0_22] : memref<128x64xf32, #tpu.memory_space<vmem>>, vector<128x64xf32>
    %cst_23 = arith.constant dense<0.000000e+00> : vector<64x64xf32>
    %34 = tpu.matmul %32, %33, %cst_23 {dimension_numbers = #tpu.dot_dimension_numbers<[1], [0], [0], [1], [0, 0, 1, 1], [], []>} : vector<64x128xf32>, vector<128x64xf32>, vector<64x64xf32> -> vector<64x64xf32>
    %c0_24 = arith.constant 0 : index
    %c576 = arith.constant 576 : index
    %35 = vector.load %arg8[%c0_24, %c576] : memref<1x640xf32, #tpu.memory_space<vmem>>, vector<1x64xf32>
    %36 = vector.broadcast %35 : vector<1x64xf32> to vector<64x64xf32>
    %37 = arith.addf %34, %36 : vector<64x64xf32>
    %c0_25 = arith.constant 0 : index
    %c0_26 = arith.constant 0 : index
    %38 = vector.load %arg2[%c0_25, %c0_26] : memref<64x5xf32, #tpu.memory_space<vmem>>, vector<64x5xf32>
    %c0_27 = arith.constant 0 : index
    %c0_28 = arith.constant 0 : index
    %39 = vector.load %arg9[%c0_27, %c0_28] : memref<5x64xf32, #tpu.memory_space<vmem>>, vector<5x64xf32>
    %cst_29 = arith.constant dense<0.000000e+00> : vector<64x64xf32>
    %40 = tpu.matmul %38, %39, %cst_29 {dimension_numbers = #tpu.dot_dimension_numbers<[1], [0], [0], [1], [0, 0, 1, 1], [], []>} : vector<64x5xf32>, vector<5x64xf32>, vector<64x64xf32> -> vector<64x64xf32>
    %c0_30 = arith.constant 0 : index
    %c0_31 = arith.constant 0 : index
    %41 = vector.load %arg14[%c0_30, %c0_31] : memref<1x640xf32, #tpu.memory_space<vmem>>, vector<1x64xf32>
    %42 = vector.broadcast %41 : vector<1x64xf32> to vector<64x64xf32>
    %43 = arith.addf %40, %42 : vector<64x64xf32>
    %cst_32 = arith.constant 2.000000e-01 : f32
    %44 = vector.broadcast %cst_32 : f32 to vector<64x64xf32>
    %45 = arith.mulf %44, %43 : vector<64x64xf32>
    %46 = arith.maximumf %43, %45 : vector<64x64xf32>
    %c0_33 = arith.constant 0 : index
    %c0_34 = arith.constant 0 : index
    %47 = vector.load %arg10[%c0_33, %c0_34] : memref<64x128xf32, #tpu.memory_space<vmem>>, vector<64x128xf32>
    %cst_35 = arith.constant dense<0.000000e+00> : vector<64x128xf32>
    %48 = tpu.matmul %46, %47, %cst_35 {dimension_numbers = #tpu.dot_dimension_numbers<[1], [0], [0], [1], [0, 0, 1, 1], [], []>} : vector<64x64xf32>, vector<64x128xf32>, vector<64x128xf32> -> vector<64x128xf32>
    %c0_36 = arith.constant 0 : index
    %c64_37 = arith.constant 64 : index
    %49 = vector.load %arg14[%c0_36, %c64_37] : memref<1x640xf32, #tpu.memory_space<vmem>>, vector<1x128xf32>
    %50 = vector.broadcast %49 : vector<1x128xf32> to vector<64x128xf32>
    %51 = arith.addf %48, %50 : vector<64x128xf32>
    %cst_38 = arith.constant 2.000000e-01 : f32
    %52 = vector.broadcast %cst_38 : f32 to vector<64x128xf32>
    %53 = arith.mulf %52, %51 : vector<64x128xf32>
    %54 = arith.maximumf %51, %53 : vector<64x128xf32>
    %c0_39 = arith.constant 0 : index
    %c0_40 = arith.constant 0 : index
    %55 = vector.load %arg11[%c0_39, %c0_40] : memref<128x256xf32, #tpu.memory_space<vmem>>, vector<128x256xf32>
    %cst_41 = arith.constant dense<0.000000e+00> : vector<64x256xf32>
    %56 = tpu.matmul %54, %55, %cst_41 {dimension_numbers = #tpu.dot_dimension_numbers<[1], [0], [0], [1], [0, 0, 1, 1], [], []>} : vector<64x128xf32>, vector<128x256xf32>, vector<64x256xf32> -> vector<64x256xf32>
    %c0_42 = arith.constant 0 : index
    %c192_43 = arith.constant 192 : index
    %57 = vector.load %arg14[%c0_42, %c192_43] : memref<1x640xf32, #tpu.memory_space<vmem>>, vector<1x256xf32>
    %58 = vector.broadcast %57 : vector<1x256xf32> to vector<64x256xf32>
    %59 = arith.addf %56, %58 : vector<64x256xf32>
    %cst_44 = arith.constant 2.000000e-01 : f32
    %60 = vector.broadcast %cst_44 : f32 to vector<64x256xf32>
    %61 = arith.mulf %60, %59 : vector<64x256xf32>
    %62 = arith.maximumf %59, %61 : vector<64x256xf32>
    %c0_45 = arith.constant 0 : index
    %c0_46 = arith.constant 0 : index
    %63 = vector.load %arg12[%c0_45, %c0_46] : memref<256x128xf32, #tpu.memory_space<vmem>>, vector<256x128xf32>
    %cst_47 = arith.constant dense<0.000000e+00> : vector<64x128xf32>
    %64 = tpu.matmul %62, %63, %cst_47 {dimension_numbers = #tpu.dot_dimension_numbers<[1], [0], [0], [1], [0, 0, 1, 1], [], []>} : vector<64x256xf32>, vector<256x128xf32>, vector<64x128xf32> -> vector<64x128xf32>
    %c0_48 = arith.constant 0 : index
    %c448_49 = arith.constant 448 : index
    %65 = vector.load %arg14[%c0_48, %c448_49] : memref<1x640xf32, #tpu.memory_space<vmem>>, vector<1x128xf32>
    %66 = vector.broadcast %65 : vector<1x128xf32> to vector<64x128xf32>
    %67 = arith.addf %64, %66 : vector<64x128xf32>
    %cst_50 = arith.constant 2.000000e-01 : f32
    %68 = vector.broadcast %cst_50 : f32 to vector<64x128xf32>
    %69 = arith.mulf %68, %67 : vector<64x128xf32>
    %70 = arith.maximumf %67, %69 : vector<64x128xf32>
    %c0_51 = arith.constant 0 : index
    %c0_52 = arith.constant 0 : index
    %71 = vector.load %arg13[%c0_51, %c0_52] : memref<128x64xf32, #tpu.memory_space<vmem>>, vector<128x64xf32>
    %cst_53 = arith.constant dense<0.000000e+00> : vector<64x64xf32>
    %72 = tpu.matmul %70, %71, %cst_53 {dimension_numbers = #tpu.dot_dimension_numbers<[1], [0], [0], [1], [0, 0, 1, 1], [], []>} : vector<64x128xf32>, vector<128x64xf32>, vector<64x64xf32> -> vector<64x64xf32>
    %c0_54 = arith.constant 0 : index
    %c576_55 = arith.constant 576 : index
    %73 = vector.load %arg14[%c0_54, %c576_55] : memref<1x640xf32, #tpu.memory_space<vmem>>, vector<1x64xf32>
    %74 = vector.broadcast %73 : vector<1x64xf32> to vector<64x64xf32>
    %75 = arith.addf %72, %74 : vector<64x64xf32>
    %c0_56 = arith.constant 0 : index
    %c0_57 = arith.constant 0 : index
    %76 = vector.load %arg15[%c0_56, %c0_57] : memref<64x128xf32, #tpu.memory_space<vmem>>, vector<64x128xf32>
    %cst_58 = arith.constant dense<0.000000e+00> : vector<64x128xf32>
    %77 = tpu.matmul %37, %76, %cst_58 {dimension_numbers = #tpu.dot_dimension_numbers<[1], [0], [0], [1], [0, 0, 1, 1], [], []>} : vector<64x64xf32>, vector<64x128xf32>, vector<64x128xf32> -> vector<64x128xf32>
    %c0_59 = arith.constant 0 : index
    %c0_60 = arith.constant 0 : index
    %78 = vector.load %arg16[%c0_59, %c0_60] : memref<64x128xf32, #tpu.memory_space<vmem>>, vector<64x128xf32>
    %cst_61 = arith.constant dense<0.000000e+00> : vector<64x128xf32>
    %79 = tpu.matmul %75, %78, %cst_61 {dimension_numbers = #tpu.dot_dimension_numbers<[1], [0], [0], [1], [0, 0, 1, 1], [], []>} : vector<64x64xf32>, vector<64x128xf32>, vector<64x128xf32> -> vector<64x128xf32>
    %80 = arith.addf %77, %79 : vector<64x128xf32>
    %c0_62 = arith.constant 0 : index
    %c0_63 = arith.constant 0 : index
    %81 = vector.load %arg19[%c0_62, %c0_63] : memref<1x161xf32, #tpu.memory_space<vmem>>, vector<1x128xf32>
    %82 = vector.broadcast %81 : vector<1x128xf32> to vector<64x128xf32>
    %83 = arith.addf %80, %82 : vector<64x128xf32>
    %cst_64 = arith.constant 2.000000e-01 : f32
    %84 = vector.broadcast %cst_64 : f32 to vector<64x128xf32>
    %85 = arith.mulf %84, %83 : vector<64x128xf32>
    %86 = arith.maximumf %83, %85 : vector<64x128xf32>
    %c0_65 = arith.constant 0 : index
    %c0_66 = arith.constant 0 : index
    %87 = vector.load %arg17[%c0_65, %c0_66] : memref<128x32xf32, #tpu.memory_space<vmem>>, vector<128x32xf32>
    %cst_67 = arith.constant dense<0.000000e+00> : vector<64x32xf32>
    %88 = tpu.matmul %86, %87, %cst_67 {dimension_numbers = #tpu.dot_dimension_numbers<[1], [0], [0], [1], [0, 0, 1, 1], [], []>} : vector<64x128xf32>, vector<128x32xf32>, vector<64x32xf32> -> vector<64x32xf32>
    %c0_68 = arith.constant 0 : index
    %c128 = arith.constant 128 : index
    %89 = vector.load %arg19[%c0_68, %c128] : memref<1x161xf32, #tpu.memory_space<vmem>>, vector<1x32xf32>
    %90 = vector.broadcast %89 : vector<1x32xf32> to vector<64x32xf32>
    %91 = arith.addf %88, %90 : vector<64x32xf32>
    %cst_69 = arith.constant 2.000000e-01 : f32
    %92 = vector.broadcast %cst_69 : f32 to vector<64x32xf32>
    %93 = arith.mulf %92, %91 : vector<64x32xf32>
    %94 = arith.maximumf %91, %93 : vector<64x32xf32>
    %c0_70 = arith.constant 0 : index
    %c0_71 = arith.constant 0 : index
    %95 = vector.load %arg18[%c0_70, %c0_71] : memref<1x32xf32, #tpu.memory_space<vmem>>, vector<1x32xf32>
    %96 = vector.broadcast %95 : vector<1x32xf32> to vector<64x32xf32>
    %97 = arith.mulf %94, %96 : vector<64x32xf32>
    %cst_72 = arith.constant dense<0.000000e+00> : vector<64xf32>
    %98 = vector.multi_reduction <add>, %97, %cst_72 [1] : vector<64x32xf32> to vector<64xf32>
    %99 = vector.shape_cast %98 : vector<64xf32> to vector<64x1xf32>
    %c0_73 = arith.constant 0 : index
    %c160 = arith.constant 160 : index
    %100 = vector.load %arg19[%c0_73, %c160] : memref<1x161xf32, #tpu.memory_space<vmem>>, vector<1x1xf32>
    %101 = vector.broadcast %100 : vector<1x1xf32> to vector<64x1xf32>
    %102 = arith.addf %99, %101 : vector<64x1xf32>
    %c0_74 = arith.constant 0 : index
    %c0_75 = arith.constant 0 : index
    %103 = vector.load %arg20[%c0_74, %c0_75] : memref<64x1xf32, #tpu.memory_space<vmem>>, vector<64x1xf32>
    tpu.vector_store %arg20[%c0_74, %c0_75], %102 {strides = array<i32>} : memref<64x1xf32, #tpu.memory_space<vmem>>, vector<64x1xf32>,
    return
  }
  func.func @transform_0(%arg0: i32) -> (i32, i32) {
    %c0_i32 = arith.constant 0 : i32
    %c0_i32_0 = arith.constant 0 : i32
    return %arg0, %c0_i32 : i32, i32
  }
  func.func @transform_1(%arg0: i32) -> (i32, i32) {
    %c0_i32 = arith.constant 0 : i32
    %c0_i32_0 = arith.constant 0 : i32
    return %arg0, %c0_i32 : i32, i32
  }
  func.func @transform_2(%arg0: i32) -> (i32, i32) {
    %c0_i32 = arith.constant 0 : i32
    %c0_i32_0 = arith.constant 0 : i32
    %c0_i32_1 = arith.constant 0 : i32
    return %c0_i32, %c0_i32_0 : i32, i32
  }
  func.func @transform_3(%arg0: i32) -> (i32, i32) {
    %c0_i32 = arith.constant 0 : i32
    %c0_i32_0 = arith.constant 0 : i32
    %c0_i32_1 = arith.constant 0 : i32
    return %c0_i32, %c0_i32_0 : i32, i32
  }
  func.func @transform_4(%arg0: i32) -> (i32, i32) {
    %c0_i32 = arith.constant 0 : i32
    %c0_i32_0 = arith.constant 0 : i32
    %c0_i32_1 = arith.constant 0 : i32
    return %c0_i32, %c0_i32_0 : i32, i32
  }
  func.func @transform_5(%arg0: i32) -> (i32, i32) {
    %c0_i32 = arith.constant 0 : i32
    %c0_i32_0 = arith.constant 0 : i32
    %c0_i32_1 = arith.constant 0 : i32
    return %c0_i32, %c0_i32_0 : i32, i32
  }
  func.func @transform_6(%arg0: i32) -> (i32, i32) {
    %c0_i32 = arith.constant 0 : i32
    %c0_i32_0 = arith.constant 0 : i32
    %c0_i32_1 = arith.constant 0 : i32
    return %c0_i32, %c0_i32_0 : i32, i32
  }
  func.func @transform_7(%arg0: i32) -> (i32, i32) {
    %c0_i32 = arith.constant 0 : i32
    %c0_i32_0 = arith.constant 0 : i32
    %c0_i32_1 = arith.constant 0 : i32
    return %c0_i32, %c0_i32_0 : i32, i32
  }
  func.func @transform_8(%arg0: i32) -> (i32, i32) {
    %c0_i32 = arith.constant 0 : i32
    %c0_i32_0 = arith.constant 0 : i32
    %c0_i32_1 = arith.constant 0 : i32
    return %c0_i32, %c0_i32_0 : i32, i32
  }
  func.func @transform_9(%arg0: i32) -> (i32, i32) {
    %c0_i32 = arith.constant 0 : i32
    %c0_i32_0 = arith.constant 0 : i32
    %c0_i32_1 = arith.constant 0 : i32
    return %c0_i32, %c0_i32_0 : i32, i32
  }
  func.func @transform_10(%arg0: i32) -> (i32, i32) {
    %c0_i32 = arith.constant 0 : i32
    %c0_i32_0 = arith.constant 0 : i32
    %c0_i32_1 = arith.constant 0 : i32
    return %c0_i32, %c0_i32_0 : i32, i32
  }
  func.func @transform_11(%arg0: i32) -> (i32, i32) {
    %c0_i32 = arith.constant 0 : i32
    %c0_i32_0 = arith.constant 0 : i32
    %c0_i32_1 = arith.constant 0 : i32
    return %c0_i32, %c0_i32_0 : i32, i32
  }
  func.func @transform_12(%arg0: i32) -> (i32, i32) {
    %c0_i32 = arith.constant 0 : i32
    %c0_i32_0 = arith.constant 0 : i32
    %c0_i32_1 = arith.constant 0 : i32
    return %c0_i32, %c0_i32_0 : i32, i32
  }
  func.func @transform_13(%arg0: i32) -> (i32, i32) {
    %c0_i32 = arith.constant 0 : i32
    %c0_i32_0 = arith.constant 0 : i32
    %c0_i32_1 = arith.constant 0 : i32
    return %c0_i32, %c0_i32_0 : i32, i32
  }
  func.func @transform_14(%arg0: i32) -> (i32, i32) {
    %c0_i32 = arith.constant 0 : i32
    %c0_i32_0 = arith.constant 0 : i32
    %c0_i32_1 = arith.constant 0 : i32
    return %c0_i32, %c0_i32_0 : i32, i32
  }
  func.func @transform_15(%arg0: i32) -> (i32, i32) {
    %c0_i32 = arith.constant 0 : i32
    %c0_i32_0 = arith.constant 0 : i32
    %c0_i32_1 = arith.constant 0 : i32
    return %c0_i32, %c0_i32_0 : i32, i32
  }
  func.func @transform_16(%arg0: i32) -> (i32, i32) {
    %c0_i32 = arith.constant 0 : i32
    %c0_i32_0 = arith.constant 0 : i32
    %c0_i32_1 = arith.constant 0 : i32
    return %c0_i32, %c0_i32_0 : i32, i32
  }
  func.func @transform_17(%arg0: i32) -> (i32, i32) {
    %c0_i32 = arith.constant 0 : i32
    %c0_i32_0 = arith.constant 0 : i32
    %c0_i32_1 = arith.constant 0 : i32
    return %c0_i32, %c0_i32_0 : i32, i32
  }
  func.func @transform_18(%arg0: i32) -> (i32, i32) {
    %c0_i32 = arith.constant 0 : i32
    %c0_i32_0 = arith.constant 0 : i32
    %c0_i32_1 = arith.constant 0 : i32
    return %c0_i32, %c0_i32_0 : i32, i32
  }
  func.func @transform_19(%arg0: i32) -> (i32, i32) {
    %c0_i32 = arith.constant 0 : i32
    %c0_i32_0 = arith.constant 0 : i32
    return %arg0, %c0_i32 : i32, i32
  }
}

</mosaic_0001>

<bundles_post_ra>
// kernel: tpu_custom_call.1
= control target key start
LH: loop header
LB: loop body
LE: loop exit
PB: predicated region body
PF: predicated region fallthrough
CT: control target
= control target key end

     0   :  { %s5354_s0 = inlined_call_operand.vmem [shape: f32[256,5], index: 0, kind: input, shape index: {}]   ;;  %s5355_s1 = inlined_call_operand.vmem [shape: f32[256,5], index: 1, kind: input, shape index: {}]   ;;  %s5356_s2 = inlined_call_operand.hbm [shape: f32[5,64], index: 2, kind: input, shape index: {}]   ;;  %s5357_s3 = inlined_call_operand.hbm [shape: f32[64,128], index: 3, kind: input, shape index: {}]   ;;  %s5358_s4 = inlined_call_operand.vmem [shape: f32[128,256], index: 4, kind: input, shape index: {}]   ;;  %s5359_s5 = inlined_call_operand.vmem [shape: f32[256,128], index: 5, kind: input, shape index: {}]   ;;  %s5360_s6 = inlined_call_operand.vmem [shape: f32[128,64], index: 6, kind: input, shape index: {}]   ;;  %s5361_s7 = inlined_call_operand.vmem [shape: f32[1,640], index: 7, kind: input, shape index: {}]   ;;  %s5362_s8 = inlined_call_operand.hbm [shape: f32[5,64], index: 8, kind: input, shape index: {}]   ;;  %s5363_s9 = inlined_call_operand.hbm [shape: f32[64,128], index: 9, kind: input, shape index: {}]   ;;  %s5364_s10 = inlined_call_operand.vmem [shape: f32[128,256], index: 10, kind: input, shape index: {}]   ;;  %s5365_s11 = inlined_call_operand.vmem [shape: f32[256,128], index: 11, kind: input, shape index: {}]   ;;  %s5366_s12 = inlined_call_operand.vmem [shape: f32[128,64], index: 12, kind: input, shape index: {}]   ;;  %s5367_s13 = inlined_call_operand.vmem [shape: f32[1,640], index: 13, kind: input, shape index: {}]   ;;  %s5368_s14 = inlined_call_operand.hbm [shape: f32[64,128], index: 14, kind: input, shape index: {}]   ;;  %s5369_s15 = inlined_call_operand.hbm [shape: f32[64,128], index: 15, kind: input, shape index: {}]   ;;  %s5370_s16 = inlined_call_operand.vmem [shape: f32[128,32], index: 16, kind: input, shape index: {}]   ;;  %s5371_s17 = inlined_call_operand.vmem [shape: f32[1,32], index: 17, kind: input, shape index: {}]   ;;  %s5372_s18 = inlined_call_operand.vmem [shape: f32[1,161], index: 18, kind: input, shape index: {}]   ;;  %s5373_s19 = inlined_call_operand.vmem [shape: f32[256,1], index: 19, kind: output, shape index: {}]  }
   0x1   :  { %5386 = sst [smem:[#allocation16_spill]] %s5354_s0 }
   0x2   :  { %5387 = sst [smem:[#allocation17_spill]] %s5355_s1 }
   0x3   :  { %5388 = sst [smem:[#allocation18_spill]] %s5356_s2 }
   0x4   :  { %5389 = sst [smem:[#allocation19_spill]] %s5357_s3 }
   0x5   :  { %5390 = sst [smem:[#allocation20_spill]] %s5365_s11 }
   0x6   :  { %5391 = sst [smem:[#allocation21_spill]] %s5366_s12 }
   0x7   :  { %5392 = sst [smem:[#allocation22_spill]] %s5370_s16 }
   0x8   :  { %5393 = sst [smem:[#allocation23_spill]] %s5371_s17 }
   0x9   :  { %5394 = sst [smem:[#allocation24_spill]] %s5372_s18 }
   0xa   :  { %5395 = sst [smem:[#allocation25_spill]] %s5373_s19 }
   0xb   :  { %24 = vsyncpa [#allocation3], 0 }
   0xc   :  { %25 = vsyncpa [#allocation5], 0 }
   0xd   :  { %26 = vsyncpa [#allocation8], 0 }
   0xe   :  { %27 = vsyncpa [#allocation11], 0  ;;  %s4340_s0 = smov 0  }
   0xf LB: > { %s4229_s30 = smov [#allocation4]   ;;  %s5376_s21 = sadd.s32 4294967295, %s4227_s0   ;;  %s4227_s0 = sphi %s4340_s0, %s33_s0  }
  0x10   : > { %s496_s20 = sshll.u32 %s4229_s30, 4  ;;  %p3049_p0 = scmp.ge.s32.totalorder %s4227_s0, 1  ;;  %s4354_s20 = int_to_ptr.vmem [resolvable:$true] %s496_s20 }
  0x11   : > { %p473_p1 = scmp.lt.s32.totalorder %s4227_s0, 5  ;;  %p4350_p2 = scmp.eq.s32.totalorder %s5376_s21, 0 }
  0x12   : > { %s4230_s2 = smov [#allocation7]   ;;  %s4231_s25 = smov [#allocation2]  }
  0x13   : > { %s5396_s1 = scalar_select %p4350_p2, 1, 0 }
  0x14   : > { %p4356_p3 = pnand %p3049_p0, %p473_p1  ;;  %s532_s23 = sshll.u32 %s4230_s2, 4  ;;  %s4362_s23 = int_to_ptr.vmem [resolvable:$true] %s532_s23 }
  0x15   : > { %s486_s3 = sshll.u32 %s4231_s25, 4  ;;  %s4232_s26 = smov [#allocation6]   ;;  %s4370_s3 = int_to_ptr.vmem [resolvable:$true] %s486_s3 }
  0x16   : > { %s5397_s22 = scalar_select %p4356_p3, 1, 0 }
  0x17   : > { %p3987_p4 = pneg %p4356_p3  ;;  %s4372_s27 = sshll.u32 %s4232_s26, 4  ;;  %s523_s27 = int_to_ptr.vmem [resolvable:$true] %s4372_s27 }
  0x18   : > { %s5399_s30 = sld [smem:[#allocation19_spill]] }
  0x19   : > { %p4366_p5 = pnand %p4350_p2, %p3987_p4 }
  0x1b   : > { %p4382_p7 = pneg %p4366_p5 }
  0x1e   : > { %s4037_s21 = scalar_lea.hbm %s5399_s30, 1024 }
  0x1f   : > { %p4038_p6 = scmp.ne.s32.totalorder %s5399_s30, %s4037_s21  ;;  %p4044_p10 = scmp.lt.u32.totalorder %s4037_s21, %s5399_s30 }
  0x21   : > { %p4040_p8 = pnand %p4382_p7, %p4038_p6 }
  0x23   : > { %p4041_p9 = pneg %p4040_p8 }
  0x25   : > { %p4046_p11 = pnand %p4044_p10, %p4041_p9 }
  0x27   : > { %4049 = shalt.err (!%p4046_p11)
}
  0x28   : > { %s4050_s19 = scalar_lea.vmem %s4354_s20, 1024  ;;  %p4058_p1 = scmp.lt.s32.totalorder %s4354_s20, %s4354_s20 }
  0x29   : > { %p4051_p12 = scmp.ne.s32.totalorder %s4354_s20, %s4050_s19  ;;  %p4059_p4 = scmp.lt.s32.totalorder %s4050_s19, %s4050_s19 }
  0x2b   : > { %p4053_p13 = pnand %p4051_p12, %p4382_p7  ;;  %p4060_p6 = por %p4059_p4, %p4058_p1 }
  0x2d   : > { %p4054_p0 = pneg %p4053_p13 }
  0x2f   : > { %p4061_p8 = pnand %p4060_p6, %p4054_p0 }
  0x31   : > { %4064 = shalt.err (!%p4061_p8)
}
  0x32   : > { %s5384_s28 = smov 128   ;;  %s4234_s21 = smov 8  }
  0x33   : > { %3993 = dma.hbm_to_vmem [thread:$0]  (!%p4366_p5), %s5399_s30, 1024, %s4354_s20, [#allocation5], %s5384_s28, %s5384_s28, %s4234_s21  }
  0x34   : > { %s4065_s19 = scalar_lea.hbm %s5363_s9, 1024 }
  0x35   : > { %p4066_p9 = scmp.ne.s32.totalorder %s5363_s9, %s4065_s19  ;;  %p4072_p12 = scmp.lt.u32.totalorder %s4065_s19, %s5363_s9 }
  0x37   : > { %p4068_p10 = pnand %p4066_p9, %p4382_p7 }
  0x39   : > { %p4069_p11 = pneg %p4068_p10 }
  0x3b   : > { %p4074_p13 = pnand %p4072_p12, %p4069_p11 }
  0x3d   : > { %4077 = shalt.err (!%p4074_p13)
}
  0x3e   : > { %s4078_s20 = scalar_lea.vmem %s4362_s23, 1024  ;;  %p4086_p6 = scmp.lt.s32.totalorder %s4362_s23, %s4362_s23 }
  0x3f   : > { %p4079_p0 = scmp.ne.s32.totalorder %s4362_s23, %s4078_s20  ;;  %p4087_p8 = scmp.lt.s32.totalorder %s4078_s20, %s4078_s20 }
  0x41   : > { %p4081_p1 = pnand %p4079_p0, %p4382_p7  ;;  %p4088_p9 = por %p4087_p8, %p4086_p6 }
  0x43   : > { %p4082_p4 = pneg %p4081_p1 }
  0x45   : > { %p4089_p10 = pnand %p4088_p9, %p4082_p4 }
  0x47   : > { %4092 = shalt.err (!%p4089_p10)
}
  0x48   : > { %3999 = dma.hbm_to_vmem [thread:$0]  (!%p4366_p5), %s5363_s9, 1024, %s4362_s23, [#allocation8], %s5384_s28, %s5384_s28, %s4234_s21  }
  0x49   : > { %s5401_s29 = sld [smem:[#allocation18_spill]] }
  0x4f   : > { %s4093_s2 = scalar_lea.hbm %s5401_s29, 128 }
  0x50   : > { %p4094_p11 = scmp.ne.s32.totalorder %s5401_s29, %s4093_s2  ;;  %p4100_p0 = scmp.lt.u32.totalorder %s4093_s2, %s5401_s29 }
  0x52   : > { %p4096_p12 = pnand %p4094_p11, %p4382_p7 }
  0x54   : > { %p4097_p13 = pneg %p4096_p12 }
  0x56   : > { %p4102_p1 = pnand %p4100_p0, %p4097_p13 }
  0x58   : > { %4105 = shalt.err (!%p4102_p1)
}
  0x59   : > { %s4106_s23 = scalar_lea.vmem %s4370_s3, 128  ;;  %p4114_p9 = scmp.lt.s32.totalorder %s4370_s3, %s4370_s3 }
  0x5a   : > { %p4107_p4 = scmp.ne.s32.totalorder %s4370_s3, %s4106_s23  ;;  %p4115_p10 = scmp.lt.s32.totalorder %s4106_s23, %s4106_s23 }
  0x5c   : > { %p4109_p6 = pnand %p4107_p4, %p4382_p7  ;;  %p4116_p11 = por %p4115_p10, %p4114_p9 }
  0x5e   : > { %p4110_p8 = pneg %p4109_p6 }
  0x60   : > { %p4117_p12 = pnand %p4116_p11, %p4110_p8 }
  0x62   : > { %4120 = shalt.err (!%p4117_p12)
}
  0x63   : > { %3990 = dma.hbm_to_vmem [thread:$0]  (!%p4366_p5), %s5401_s29, 128, %s4370_s3, [#allocation3]  }
  0x64   : > { %s4121_s2 = scalar_lea.hbm %s5362_s8, 128 }
  0x65   : > { %p4122_p13 = scmp.ne.s32.totalorder %s5362_s8, %s4121_s2  ;;  %p4128_p4 = scmp.lt.u32.totalorder %s4121_s2, %s5362_s8 }
  0x67   : > { %p4124_p0 = pnand %p4122_p13, %p4382_p7 }
  0x69   : > { %p4125_p1 = pneg %p4124_p0 }
  0x6b   : > { %p4130_p6 = pnand %p4128_p4, %p4125_p1 }
  0x6d   : > { %4133 = shalt.err (!%p4130_p6)
}
  0x6e   : > { %s4134_s23 = scalar_lea.vmem %s523_s27, 128  ;;  %p4142_p11 = scmp.lt.s32.totalorder %s523_s27, %s523_s27 }
  0x6f   : > { %p4135_p8 = scmp.ne.s32.totalorder %s523_s27, %s4134_s23  ;;  %p4143_p12 = scmp.lt.s32.totalorder %s4134_s23, %s4134_s23 }
  0x71   : > { %p4137_p9 = pnand %p4135_p8, %p4382_p7  ;;  %p4144_p2 = por %p4143_p12, %p4142_p11 }
  0x73   : > { %p4138_p10 = pneg %p4137_p9 }
  0x75   : > { %p4145_p3 = pnand %p4144_p2, %p4138_p10 }
  0x77   : > { %4148 = shalt.err (!%p4145_p3)
}
  0x78   : > { %3996 = dma.hbm_to_vmem [thread:$0]  (!%p4366_p5), %s5362_s8, 128, %s523_s27, [#allocation5]  }
  0x79   : > { %s4235_s12 = smov [#allocation9]   ;;  %s4236_s18 = smov [#allocation10]  }
  0x7a   : > { %s557_s16 = sshll.u32 %s4235_s12, 4  ;;  %s570_s2 = sshll.u32 %s4236_s18, 4  ;;  %s558_s16 = int_to_ptr.vmem [resolvable:$true] %s557_s16  ;;  %s571_s2 = int_to_ptr.vmem [resolvable:$true] %s570_s2 }
  0x7b   : > { %s4149_s19 = scalar_lea.hbm %s5368_s14, 1024 }
  0x7c   : > { %p4150_p2 = scmp.ne.s32.totalorder %s5368_s14, %s4149_s19  ;;  %p4156_p0 = scmp.lt.u32.totalorder %s4149_s19, %s5368_s14 }
  0x7e   : > { %p4152_p3 = pnand %p4150_p2, %p4382_p7 }
  0x80   : > { %p4153_p13 = pneg %p4152_p3 }
  0x82   : > { %p4158_p1 = pnand %p4156_p0, %p4153_p13 }
  0x84   : > { %4161 = shalt.err (!%p4158_p1)
}
  0x85   : > { %s4162_s27 = scalar_lea.vmem %s558_s16, 1024  ;;  %p4170_p9 = scmp.lt.s32.totalorder %s558_s16, %s558_s16 }
  0x86   : > { %p4163_p4 = scmp.ne.s32.totalorder %s558_s16, %s4162_s27  ;;  %p4171_p10 = scmp.lt.s32.totalorder %s4162_s27, %s4162_s27 }
  0x88   : > { %p4165_p6 = pnand %p4163_p4, %p4382_p7  ;;  %p4172_p11 = por %p4171_p10, %p4170_p9 }
  0x8a   : > { %p4166_p8 = pneg %p4165_p6 }
  0x8c   : > { %p4173_p12 = pnand %p4172_p11, %p4166_p8 }
  0x8e   : > { %4176 = shalt.err (!%p4173_p12)
}
  0x8f   : > { %s5402_s11 = smov 128   ;;  %s4177_s26 = scalar_lea.hbm %s5369_s15, 1024 }
  0x90   : > { %4002 = dma.hbm_to_vmem [thread:$0]  (!%p4366_p5), %s5368_s14, 1024, %s558_s16, [#allocation8], %s5402_s11, %s5402_s11, %s4234_s21  }
  0x91   : > { %p4178_p2 = scmp.ne.s32.totalorder %s5369_s15, %s4177_s26  ;;  %p4184_p0 = scmp.lt.u32.totalorder %s4177_s26, %s5369_s15 }
  0x93   : > { %p4180_p3 = pnand %p4178_p2, %p4382_p7 }
  0x95   : > { %p4181_p13 = pneg %p4180_p3 }
  0x97   : > { %p4186_p1 = pnand %p4184_p0, %p4181_p13 }
  0x99   : > { %4189 = shalt.err (!%p4186_p1)
}
  0x9a   : > { %s4190_s27 = scalar_lea.vmem %s571_s2, 1024  ;;  %p4198_p9 = scmp.lt.s32.totalorder %s571_s2, %s571_s2 }
  0x9b   : > { %p4191_p4 = scmp.ne.s32.totalorder %s571_s2, %s4190_s27  ;;  %p4199_p10 = scmp.lt.s32.totalorder %s4190_s27, %s4190_s27 }
  0x9d   : > { %p4193_p6 = pnand %p4191_p4, %p4382_p7  ;;  %p4200_p11 = por %p4199_p10, %p4198_p9 }
  0x9f   : > { %p4194_p8 = pneg %p4193_p6 }
  0xa1   : > { %p4201_p12 = pnand %p4200_p11, %p4194_p8 }
  0xa3   : > { %4204 = shalt.err (!%p4201_p12)
}
  0xa4   : > { %4005 = dma.hbm_to_vmem [thread:$0]  (!%p4366_p5), %s5369_s15, 1024, %s571_s2, [#allocation11], %s5402_s11, %s5402_s11, %s4234_s21  }
  0xa5   : > { %p5403_p2 = scmp.ne.s32.totalorder %s5397_s22, 0 }
  0xa6   : > { %p5404_p7 = scmp.ne.s32.totalorder (!%p5403_p2), %s5396_s1, 0 }
  0xa7   : > { %613 = sbr.rel (%p5403_p2) target bundleno = 2728 (0xaa8), region = 96 }
  0xae   : > { %4210 = dma.done.wait (%p5404_p7), [#allocation3], 128  }
  0xaf   : > { %4212 = vsyncadd (%p5404_p7), [#allocation3], 4294967168 }
  0xb0   : > { %4214 = dma.done.wait (%p5404_p7), [#allocation5], 1152  }
  0xb1   : > { %4216 = vsyncadd (%p5404_p7), [#allocation5], 4294966144 }
  0xb2   : > { %4218 = dma.done.wait (%p5404_p7), [#allocation8], 2048  }
  0xb3   : > { %4220 = vsyncadd (%p5404_p7), [#allocation8], 4294965248 }
  0xb4   : > { %4222 = dma.done.wait (%p5404_p7), [#allocation11], 1024  }
  0xb5   : > { %4224 = vsyncadd (%p5404_p7), [#allocation11], 4294966272  ;;  %s5405_s17 = sadd.s32 4294967295, %s4227_s0   ;;  %vm753_vm0 = vcmask 1044480   ;;  %vm728_vm1 = vcmask 39936   ;;  %s5406_s11 = sld [smem:[#allocation16_spill]]  ;;  %v888_v21 = vlaneseq }
  0xb6   : > { %s3064_s22 = sshll.u32 %s5405_s17, 3  ;;  %v720_v0 = vld [vmem:[#allocation2] sm:$0x1f]  ;;  %v878_v4 = vld [vmem:[#allocation4] sm:$0xff]  ;;  %v879_v5 = vld [vmem:[#allocation4 + $0x8] sm:$0xff]  ;;  %s4237_s21 = smov 64  }
  0xb7   : > { %p695_p5 = scmp.lt.s32.totalorder %s3064_s22, 31  ;;  %3395 = vmatprep.subr.msk.mxu0 %vm753_vm0, %v720_v0  ;;  %v880_v6 = vld [vmem:[#allocation4 + $0x10] sm:$0xff]  ;;  %v3667_v8 = vpack.c.bf16 %v879_v5, %v878_v4  ;;  %v881_v9 = vld [vmem:[#allocation4 + $0x18] sm:$0xff]  ;;  %v882_v15 = vld [vmem:[#allocation4 + $0x20] sm:$0xff]  ;;  %v4567_v28 = vshrl.u32 %v888_v21, 7  ;;  %vm900_vm2 = vcmask 523264  }
  0xb8   : > { %3396 = vmatpush3.msk.msra.mxu0 %vm753_vm0, %v720_v0  ;;  %v3671_v11 = vpack.c.bf16 %v881_v9, %v880_v6  ;;  %v883_v16 = vld [vmem:[#allocation4 + $0x28] sm:$0xff]  ;;  %v884_v18 = vld [vmem:[#allocation4 + $0x30] sm:$0xff]  ;;  %v885_v19 = vld [vmem:[#allocation4 + $0x38] sm:$0xff]  ;;  %s5407_s2 = sld [smem:[#allocation17_spill]]  ;;  %s5408_s3 = sld [smem:[#allocation20_spill]]  ;;  %vm2845_vm3 = vcmask 261120  }
  0xb9   : > { %s5415_s22 = smov (!%p695_p5, %s3064_s22), 31  ;;  %3668 = vmatprep.subr.bf16.mxu1 %v3667_v8  ;;  %v3675_v17 = vpack.c.bf16 %v883_v16, %v882_v15  ;;  %v3679_v20 = vpack.c.bf16 %v885_v19, %v884_v18  ;;  %v1049_v22 = vld [vmem:[%s5358_s4 + $0x8] sm:$0xff]  ;;  %v1051_v23 = vld [vmem:[%s5358_s4 + $0x18] sm:$0xff]  ;;  %v1048_v25 = vld [vmem:[%s5358_s4] sm:$0xff]  ;;  %v4588_v37 = vsub.s32 0, %v4567_v28  ;;  %v4591_v38 = vsub.s32 1, %v4567_v28 }
  0xba   : > { %s4536_s24 = sshll.u32 %s5415_s22, 3  ;;  %3670 = vmatpush3.bf16.msra.mxu1 %v3667_v8  ;;  %v3683_v24 = vpack.c.bf16 %v1051_v23, %v1049_v22  ;;  %v1050_v26 = vld [vmem:[%s5358_s4 + $0x10] sm:$0xff]  ;;  %v1053_v27 = vld [vmem:[%s5358_s4 + $0x28] sm:$0xff]  ;;  %v1055_v30 = vld [vmem:[%s5358_s4 + $0x38] sm:$0xff]  ;;  %s5409_s22 = sld [smem:[#allocation21_spill]]  ;;  %vm2910_vm4 = vcmask 7168  }
  0xbb   : > { %s698_s12 = scalar_lea.vmem %s5406_s11, %s4536_s24  ;;  %3672 = vmatprep.subr.bf16.mxu1 %v3671_v11  ;;  %v3685_v29 = vpack.c.bf16 %v1050_v26, %v1048_v25  ;;  %v1052_v31 = vld [vmem:[%s5358_s4 + $0x20] sm:$0xff]  ;;  %v1054_v32 = vld [vmem:[%s5358_s4 + $0x30] sm:$0xff]  ;;  %v3687_v34 = vpack.c.bf16 %v1055_v30, %v1053_v27  ;;  %v1057_v35 = vld [vmem:[%s5358_s4 + $0x48] sm:$0xff]  ;;  %s5410_s25 = sld [smem:[#allocation22_spill]] }
  0xbc   : > { %v712_v1 = vld [vmem:[%s698_s12] sm:$0xff]  ;;  %v713_v2 = vld [vmem:[%s698_s12 + $0x8] sm:$0xff]  ;;  %v714_v3 = vld [vmem:[%s698_s12 + $0x10] sm:$0xff]  ;;  %3684 = vmatprep.subr.bf16.mxu0 %v3683_v24  ;;  %v3689_v39 = vpack.c.bf16 %v1054_v32, %v1052_v31  ;;  %s5411_s27 = sld [smem:[#allocation24_spill]]  ;;  %s5413_s18 = sld [smem:[#allocation25_spill]] }
  0xbd   : > { %3397 = vmatprep.mubr.msk.f32.mxu0 %vm728_vm1, %v712_v1  ;;  %v715_v7 = vld [vmem:[%s698_s12 + $0x18] sm:$0xff]  ;;  %v716_v10 = vld [vmem:[%s698_s12 + $0x20] sm:$0xff]  ;;  %v717_v12 = vld [vmem:[%s698_s12 + $0x28] sm:$0xff] }
  0xbe   : > { %3398 = vmatmul.mubr.msk.f32.vlgmr.msra.gmra.mrb[0].mxu0 %vm728_vm1, %v713_v2  ;;  %v718_v13 = vld [vmem:[%s698_s12 + $0x30] sm:$0xff]  ;;  %3674 = vmatpush3.bf16.msra.mxu1 %v3671_v11  ;;  %v719_v14 = vld [vmem:[%s698_s12 + $0x38] sm:$0xff]  ;;  %v886_v33 = vld [vmem:[%s5361_s7] sm:$0x3]  ;;  %s704_s11 = scalar_lea.vmem %s5407_s2, %s4536_s24  ;;  %s4239_s12 = smov 96  }
  0xbf   : > { %3400 = vmatprep.mubr.msk.f32.mxu0 %vm728_vm1, %v714_v3  ;;  %3676 = vmatprep.subr.bf16.mxu1 %v3675_v17  ;;  %v1059_v36 = vld [vmem:[%s5358_s4 + $0x58] sm:$0xff]  ;;  %v1056_v41 = vld [vmem:[%s5358_s4 + $0x40] sm:$0xff]  ;;  %v1058_v42 = vld [vmem:[%s5358_s4 + $0x50] sm:$0xff]  ;;  %v891_v43 = vrot.slane %v886_v33, %v4588_v37  ;;  %v895_v46 = vrot.slane %v886_v33, %v4591_v38 }
  0xc0   : > { %3686 = vmatpush1.bf16.msra.mxu0 %v3685_v29  ;;  %v3691_v40 = vpack.c.bf16 %v1059_v36, %v1057_v35  ;;  %v1061_v44 = vld [vmem:[%s5358_s4 + $0x68] sm:$0xff]  ;;  %v1063_v45 = vld [vmem:[%s5358_s4 + $0x78] sm:$0xff]  ;;  %v3693_v47 = vpack.c.bf16 %v1058_v42, %v1056_v41  ;;  %v1060_v49 = vld [vmem:[%s5358_s4 + $0x60] sm:$0xff] }
  0xc1   : > { %3688 = vmatprep.subr.bf16.mxu0 %v3687_v34  ;;  %896 = vrot.lane.b32.xlu0 %v891_v43, %s4237_s21  ;;  %v3695_v48 = vpack.c.bf16 %v1063_v45, %v1061_v44  ;;  %v1062_v50 = vld [vmem:[%s5358_s4 + $0x70] sm:$0xff]  ;;  %v1065_v51 = vld [vmem:[%s5358_s4 + $0x88] sm:$0xff]  ;;  %v1067_v52 = vld [vmem:[%s5358_s4 + $0x98] sm:$0xff] }
  0xc2   : > { %3401 = vmatmul.mubr.msk.f32.gmra.mrb[2].mxu0 %vm728_vm1, %v715_v7  ;;  %3678 = vmatpush3.bf16.msra.mxu1 %v3675_v17  ;;  %v3697_v53 = vpack.c.bf16 %v1062_v50, %v1060_v49  ;;  %v3699_v54 = vpack.c.bf16 %v1067_v52, %v1065_v51  ;;  %v1064_v55 = vld [vmem:[%s5358_s4 + $0x80] sm:$0xff]  ;;  %v1066_v56 = vld [vmem:[%s5358_s4 + $0x90] sm:$0xff]  ;;  %v1069_v57 = vld [vmem:[%s5358_s4 + $0xa8] sm:$0xff]  ;;  %v1092_v50 = vsub.s32 2, %v4567_v28  ;;  %s710_s26 = scalar_lea.vmem %s5413_s18, %s4536_s24 }
  0xc3   : > { %3403 = vmatprep.mubr.msk.f32.mxu0 %vm728_vm1, %v716_v10  ;;  %3680 = vmatprep.subr.bf16.mxu1 %v3679_v20  ;;  %v1071_v58 = vld [vmem:[%s5358_s4 + $0xb8] sm:$0xff]  ;;  %v3701_v59 = vpack.c.bf16 %v1066_v56, %v1064_v55  ;;  %v1068_v61 = vld [vmem:[%s5358_s4 + $0xa0] sm:$0xff]  ;;  %v1070_v62 = vld [vmem:[%s5358_s4 + $0xb0] sm:$0xff] }
  0xc4   : > { %3690 = vmatpush1.bf16.msra.mxu0 %v3689_v39  ;;  %v3703_v60 = vpack.c.bf16 %v1071_v58, %v1069_v57  ;;  %v3705_v63 = vpack.c.bf16 %v1070_v62, %v1068_v61  ;;  %v3070_v0 = vld [vmem:[%s5361_s7] ss:$0 sm:$0xff]  ;;  %v1073_v34 = vld [vmem:[%s5358_s4 + $0xc8] sm:$0xff]  ;;  %v1075_v35 = vld [vmem:[%s5358_s4 + $0xd8] sm:$0xff] }
  0xc5   : > { %3692 = vmatprep.subr.bf16.mxu0 %v3691_v40  ;;  %898 = vrot.lane.b32.xlu0 %v895_v46, %s4237_s21  ;;  %v3707_v36 = vpack.c.bf16 %v1075_v35, %v1073_v34  ;;  %v1072_v39 = vld [vmem:[%s5358_s4 + $0xc0] sm:$0xff]  ;;  %v1074_v40 = vld [vmem:[%s5358_s4 + $0xd0] sm:$0xff]  ;;  %v1077_v42 = vld [vmem:[%s5358_s4 + $0xe8] sm:$0xff] }
  0xc6   : > { %3404 = vmatmul.mubr.msk.f32.gmra.mrb[4].mxu0 %vm728_vm1, %v717_v12  ;;  %3682 = vmatpush3.bf16.msra.mxu1 %v3679_v20  ;;  %v3709_v41 = vpack.c.bf16 %v1074_v40, %v1072_v39  ;;  %v1079_v43 = vld [vmem:[%s5358_s4 + $0xf8] sm:$0xff]  ;;  %v1076_v45 = vld [vmem:[%s5358_s4 + $0xe0] sm:$0xff]  ;;  %v1078_v46 = vld [vmem:[%s5358_s4 + $0xf0] sm:$0xff] }
  0xc7   : > { %3406 = vmatprep.mubr.msk.f32.mxu0 %vm728_vm1, %v718_v13  ;;  %v3711_v44 = vpack.c.bf16 %v1079_v43, %v1077_v42  ;;  %v1080_v49 = vld [vmem:[%s5361_s7 + $0x1] sm:$0x7]  ;;  %v1266_v52 = vld [vmem:[%s5359_s5 + $0x88] sm:$0xff]  ;;  %v1267_v58 = vld [vmem:[%s5359_s5 + $0x90] sm:$0xff] }
  0xc8   : > { %3694 = vmatpush1.bf16.msra.mxu0 %v3693_v47  ;;  %v3713_v47 = vpack.c.bf16 %v1078_v46, %v1076_v45  ;;  %v1265_v51 = vld [vmem:[%s5359_s5 + $0x80] sm:$0xff]  ;;  %v1250_v57 = vld [vmem:[%s5359_s5 + $0x8] sm:$0xff]  ;;  %v1251_v61 = vld [vmem:[%s5359_s5 + $0x10] sm:$0xff] }
  0xc9   : > { %3696 = vmatprep.subr.bf16.mxu0 %v3695_v48  ;;  %v4238_v48 = vmov 0.0   ;;  %v3715_v55 = vpack.c.bf16 %v1266_v52, %v1265_v51  ;;  %v1249_v56 = vld [vmem:[%s5359_s5] sm:$0xff]  ;;  %v1252_v62 = vld [vmem:[%s5359_s5 + $0x18] sm:$0xff]  ;;  %v2100_v28 = vld [vmem:[%s5408_s3 + $0x90] sm:$0xff] }
  0xca   : > { %3407 = vmatmul.mubr.msk.f32.gmra.mrb[6].mxu0 %vm728_vm1, %v719_v14 }
  0xcb   : > { %1168 = vmatprep.mubr.f32.mxu0 %v4238_v48  ;;  %3716 = vmatprep.subr.bf16.mxu1 %v3715_v55 }
  0xcc   : > { %3698 = vmatpush1.bf16.msra.mxu0 %v3697_v53  ;;  %v1089_v53 = vrot.slane %v1080_v49, %v4591_v38 }
  0xcd   : > { %3700 = vmatprep.subr.bf16.mxu0 %v3699_v54  ;;  %v1085_v54 = vrot.slane %v1080_v49, %v4588_v37 }
  0xce   : > { %1096 = vrot.lane.b32.xlu1 %v1089_v53, %s4237_s21 }
  0xcf   : > { %1094 = vrot.lane.b32.xlu0 %v1085_v54, %s4237_s21 }
  0xd0   : > { %3702 = vmatpush1.bf16.msra.mxu0 %v3701_v59  ;;  %v3717_v59 = vpack.c.bf16 %v1250_v57, %v1249_v56 }
  0xd1   : > { %3704 = vmatprep.subr.bf16.mxu0 %v3703_v60  ;;  %v1268_v60 = vld [vmem:[%s5359_s5 + $0x98] sm:$0xff] }
  0xd4   : > { %3706 = vmatpush1.bf16.msra.mxu0 %v3705_v63  ;;  %v1093_v63 = vrot.slane %v1080_v49, %v1092_v50 }
  0xd5   : > { %3708 = vmatprep.subr.bf16.mxu0 %v3707_v36 }
  0xd6   : > { %1098 = vrot.lane.b32.xlu1 %v1093_v63, %s4237_s21 }
  0xd8   : > { %3710 = vmatpush1.bf16.msra.mxu0 %v3709_v41 }
  0xd9   : > { %3712 = vmatprep.subr.bf16.mxu0 %v3711_v44 }
  0xdc   : > { %3714 = vmatpush1.bf16.msra.mxu0 %v3713_v47 }
 0x191   : > { %v3399_v1 = vpop.f32.mrb[0].mxu0 }
 0x192   : > { %v829_v2 = vadd.f32 %v3399_v1, %v3070_v0  ;;  %v823_v3 = vpop.f32.mrb[1].mxu0  ;;  %v1269_v1 = vld [vmem:[%s5359_s5 + $0xa0] sm:$0xff] }
 0x193   : > { %v824_v4 = vadd.f32 %v3070_v0, %v823_v3  ;;  %v3721_v3 = vpack.c.bf16 %v1252_v62, %v1251_v61 }
 0x194   : > { %v863_v5 = vmul.f32 0.2, %v829_v2 }
 0x195   : > { %v862_v6 = vmul.f32 0.2, %v824_v4  ;;  %v3402_v7 = vpop.f32.mrb[2].mxu0 }
 0x196   : > { %v839_v8 = vadd.f32 %v3402_v7, %v3070_v0  ;;  %v833_v9 = vpop.f32.mrb[3].mxu0  ;;  %v871_v12 = vmax.f32 %v829_v2, %v863_v5  ;;  %v1270_v2 = vld [vmem:[%s5359_s5 + $0xa8] sm:$0xff]  ;;  %v1253_v5 = vld [vmem:[%s5359_s5 + $0x20] sm:$0xff]  ;;  %v1271_v7 = vld [vmem:[%s5359_s5 + $0xb0] sm:$0xff] }
 0x197   : > { %v834_v10 = vadd.f32 %v3070_v0, %v833_v9  ;;  %v870_v11 = vmax.f32 %v824_v4, %v862_v6  ;;  %v3723_v4 = vpack.c.bf16 %v1270_v2, %v1269_v1  ;;  %v1254_v6 = vld [vmem:[%s5359_s5 + $0x28] sm:$0xff]  ;;  %v1277_v2 = vld [vmem:[%s5359_s5 + $0xe0] sm:$0xff] }
 0x198   : > { %v865_v13 = vmul.f32 0.2, %v839_v8  ;;  %v3725_v9 = vpack.c.bf16 %v1254_v6, %v1253_v5  ;;  %v1261_v5 = vld [vmem:[%s5359_s5 + $0x60] sm:$0xff]  ;;  %v1262_v6 = vld [vmem:[%s5359_s5 + $0x68] sm:$0xff] }
 0x199   : > { %v864_v14 = vmul.f32 0.2, %v834_v10  ;;  %v3405_v15 = vpop.f32.mrb[4].mxu0  ;;  %3425 = vmatprep.mubr.msk.f32.mxu1 %vm900_vm2, %v870_v11  ;;  %v1255_v11 = vld [vmem:[%s5359_s5 + $0x30] sm:$0xff] }
 0x19a   : > { %v873_v16 = vmax.f32 %v839_v8, %v865_v13  ;;  %v849_v17 = vadd.f32 %v3405_v15, %v3070_v0  ;;  %v843_v18 = vpop.f32.mrb[5].mxu0  ;;  %3426 = vmatmul.mubr.msk.f32.vlgmr.msra.gmra.mrb[0].mxu1 %vm900_vm2, %v871_v12  ;;  %v1272_v8 = vld [vmem:[%s5359_s5 + $0xb8] sm:$0xff]  ;;  %v1273_v13 = vld [vmem:[%s5359_s5 + $0xc0] sm:$0xff] }
 0x19b   : > { %v872_v19 = vmax.f32 %v834_v10, %v864_v14  ;;  %v844_v20 = vadd.f32 %v3070_v0, %v843_v18  ;;  %3718 = vmatpush3.bf16.msra.mxu1 %v3717_v59  ;;  %v3727_v10 = vpack.c.bf16 %v1272_v8, %v1271_v7  ;;  %v1256_v12 = vld [vmem:[%s5359_s5 + $0x38] sm:$0xff]  ;;  %v1274_v14 = vld [vmem:[%s5359_s5 + $0xc8] sm:$0xff]  ;;  %v3741_v7 = vpack.c.bf16 %v1262_v6, %v1261_v5  ;;  %v1279_v8 = vld [vmem:[%s5359_s5 + $0xf0] sm:$0xff] }
 0x19c   : > { %v867_v21 = vmul.f32 0.2, %v849_v17  ;;  %v3729_v15 = vpack.c.bf16 %v1256_v12, %v1255_v11  ;;  %v1258_v18 = vld [vmem:[%s5359_s5 + $0x48] sm:$0xff]  ;;  %v1263_v11 = vld [vmem:[%s5359_s5 + $0x70] sm:$0xff]  ;;  %v1264_v12 = vld [vmem:[%s5359_s5 + $0x78] sm:$0xff] }
 0x19d   : > { %v866_v22 = vmul.f32 0.2, %v844_v20  ;;  %v3408_v23 = vpop.f32.mrb[6].mxu0  ;;  %3428 = vmatprep.mubr.msk.f32.mxu1 %vm900_vm2, %v872_v19  ;;  %v1275_v19 = vld [vmem:[%s5359_s5 + $0xd0] sm:$0xff] }
 0x19e   : > { %v875_v24 = vmax.f32 %v849_v17, %v867_v21  ;;  %v859_v25 = vadd.f32 %v3408_v23, %v3070_v0  ;;  %v853_v26 = vpop.f32.mrb[7].mxu0  ;;  %3429 = vmatmul.mubr.msk.f32.gmra.mrb[2].mxu1 %vm900_vm2, %v873_v16  ;;  %v3731_v16 = vpack.c.bf16 %v1274_v14, %v1273_v13  ;;  %v1257_v17 = vld [vmem:[%s5359_s5 + $0x40] sm:$0xff]  ;;  %v1259_v23 = vld [vmem:[%s5359_s5 + $0x50] sm:$0xff]  ;;  %v3745_v13 = vpack.c.bf16 %v1264_v12, %v1263_v11  ;;  %v1556_v14 = vld [vmem:[#allocation6] sm:$0x1f] }
 0x19f   : > { %v874_v27 = vmax.f32 %v844_v20, %v866_v22  ;;  %v854_v29 = vadd.f32 %v3070_v0, %v853_v26  ;;  %v3719_v0 = vpack.c.bf16 %v1268_v60, %v1267_v58  ;;  %v1276_v20 = vld [vmem:[%s5359_s5 + $0xd8] sm:$0xff]  ;;  %v3733_v21 = vpack.c.bf16 %v1258_v18, %v1257_v17  ;;  %v897_v26 = vpop.permute.xlu0 %896  ;;  %v1419_v17 = vld [vmem:[%s5360_s6 + $0x8] sm:$0xff] }
 0x1a0   : > { %v869_v30 = vmul.f32 0.2, %v859_v25  ;;  %v3735_v22 = vpack.c.bf16 %v1276_v20, %v1275_v19 }
 0x1a1   : > { %v868_v31 = vmul.f32 0.2, %v854_v29  ;;  %3431 = vmatprep.mubr.msk.f32.mxu1 %vm900_vm2, %v874_v27  ;;  %3720 = vmatprep.subr.bf16.mxu1 %v3719_v0 }
 0x1a2   : > { %v877_v32 = vmax.f32 %v859_v25, %v869_v30  ;;  %3432 = vmatmul.mubr.msk.f32.gmra.mrb[4].mxu1 %vm900_vm2, %v875_v24  ;;  %v1260_v24 = vld [vmem:[%s5359_s5 + $0x58] sm:$0xff] }
 0x1a3   : > { %v876_v33 = vmax.f32 %v854_v29, %v868_v31  ;;  %3722 = vmatpush3.bf16.msra.mxu1 %v3721_v3  ;;  %v3737_v25 = vpack.c.bf16 %v1260_v24, %v1259_v23  ;;  %v899_v27 = vpop.permute.xlu0 %898  ;;  %v1278_v3 = vld [vmem:[%s5359_s5 + $0xe8] sm:$0xff]  ;;  %v1422_v24 = vld [vmem:[%s5360_s6 + $0x20] sm:$0xff] }
 0x1a4   : > { %3724 = vmatprep.subr.bf16.mxu1 %v3723_v4  ;;  %v901_v30 = vsel %vm900_vm2, %v897_v26, %v899_v27  ;;  %v3739_v4 = vpack.c.bf16 %v1278_v3, %v1277_v2  ;;  %v1424_v27 = vld [vmem:[%s5360_s6 + $0x30] sm:$0xff] }
 0x1a5   : > { %3434 = vmatprep.mubr.msk.f32.mxu1 %vm900_vm2, %v876_v33 }
 0x1a6   : > { %3435 = vmatmul.mubr.msk.f32.gmra.mrb[6].mxu1 %vm900_vm2, %v877_v32 }
 0x1a7   : > { %3726 = vmatpush3.bf16.msra.mxu1 %v3725_v9  ;;  %v1280_v9 = vld [vmem:[%s5359_s5 + $0xf8] sm:$0xff] }
 0x1a8   : > { %3728 = vmatprep.subr.bf16.mxu1 %v3727_v10  ;;  %v3743_v10 = vpack.c.bf16 %v1280_v9, %v1279_v8 }
 0x1ab   : > { %3730 = vmatpush3.bf16.msra.mxu1 %v3729_v15  ;;  %v1281_v15 = vld [vmem:[%s5361_s7 + $0x3] sm:$0x3] }
 0x1ac   : > { %3732 = vmatprep.subr.bf16.mxu1 %v3731_v16  ;;  %v1418_v16 = vld [vmem:[%s5360_s6] sm:$0xff]  ;;  %v1286_v18 = vrot.slane %v1281_v15, %v4588_v37  ;;  %v1290_v19 = vrot.slane %v1281_v15, %v4591_v38 }
 0x1ad   : > { %v3747_v20 = vpack.c.bf16 %v1419_v17, %v1418_v16 }
 0x1ae   : > { %1291 = vrot.lane.b32.xlu1 %v1286_v18, %s4237_s21  ;;  %1293 = vrot.lane.b32.xlu0 %v1290_v19, %s4237_s21 }
 0x1af   : > { %3734 = vmatpush3.bf16.msra.mxu1 %v3733_v21  ;;  %v1420_v21 = vld [vmem:[%s5360_s6 + $0x10] sm:$0xff]  ;;  %3748 = vmatprep.subr.bf16.mxu0 %v3747_v20 }
 0x1b0   : > { %3736 = vmatprep.subr.bf16.mxu1 %v3735_v22  ;;  %v1421_v22 = vld [vmem:[%s5360_s6 + $0x18] sm:$0xff] }
 0x1b1   : > { %v3751_v23 = vpack.c.bf16 %v1421_v22, %v1420_v21 }
 0x1b3   : > { %3738 = vmatpush3.bf16.msra.mxu1 %v3737_v25  ;;  %v1423_v25 = vld [vmem:[%s5360_s6 + $0x28] sm:$0xff] }
 0x1b4   : > { %3740 = vmatprep.subr.bf16.mxu1 %v3739_v4  ;;  %v3755_v26 = vpack.c.bf16 %v1423_v25, %v1422_v24 }
 0x1b7   : > { %3742 = vmatpush3.bf16.msra.mxu1 %v3741_v7 }
 0x1b8   : > { %3744 = vmatprep.subr.bf16.mxu1 %v3743_v10 }
 0x1bb   : > { %3746 = vmatpush3.bf16.msra.mxu1 %v3745_v13 }
 0x1bc   : > { %3481 = vmatprep.subr.msk.mxu1 %vm753_vm0, %v1556_v14 }
 0x26d   : > { %v3427_v29 = vpop.f32.mrb[0].mxu1 }
 0x26e   : > { %v993_v31 = vpop.f32.mrb[1].mxu1  ;;  %v999_v32 = vadd.f32 %v3427_v29, %v901_v30  ;;  %v1425_v29 = vld [vmem:[%s5360_s6 + $0x38] sm:$0xff] }
 0x26f   : > { %v994_v33 = vadd.f32 %v993_v31, %v901_v30  ;;  %v1426_v31 = vld [vmem:[%s5360_s6 + $0x40] sm:$0xff] }
 0x270   : > { %v1033_v39 = vmul.f32 0.2, %v999_v32 }
 0x271   : > { %v1032_v34 = vmul.f32 0.2, %v994_v33  ;;  %v3430_v35 = vpop.f32.mrb[2].mxu1 }
 0x272   : > { %v1003_v36 = vpop.f32.mrb[3].mxu1  ;;  %v1041_v44 = vmax.f32 %v999_v32, %v1033_v39  ;;  %v1009_v45 = vadd.f32 %v3430_v35, %v901_v30  ;;  %v1427_v32 = vld [vmem:[%s5360_s6 + $0x48] sm:$0xff]  ;;  %v1095_v35 = vpop.permute.xlu0 %1094 }
 0x273   : > { %v1040_v40 = vmax.f32 %v994_v33, %v1032_v34  ;;  %v1004_v41 = vadd.f32 %v1003_v36, %v901_v30  ;;  %v3763_v33 = vpack.c.bf16 %v1427_v32, %v1426_v31  ;;  %v1097_v34 = vpop.permute.xlu1 %1096 }
 0x274   : > { %v1035_v51 = vmul.f32 0.2, %v1009_v45  ;;  %v4829_v39 = vsel %vm900_vm2, %v1095_v35, %v1097_v34 }
 0x275   : > { %v3433_v42 = vpop.f32.mrb[4].mxu1  ;;  %1169 = vmatmul.mubr.f32.vlgmr.msra.gmra.mrb[8].mxu0 %v1040_v40  ;;  %v1034_v46 = vmul.f32 0.2, %v1004_v41 }
 0x276   : > { %v1013_v43 = vpop.f32.mrb[5].mxu1  ;;  %1174 = vmatprep.mubr.f32.mxu0 %v4238_v48  ;;  %v1043_v54 = vmax.f32 %v1009_v45, %v1035_v51  ;;  %v1019_v55 = vadd.f32 %v3433_v42, %v901_v30  ;;  %3750 = vmatpush3.bf16.msra.mxu0 %v3747_v20 }
 0x277   : > { %v1042_v52 = vmax.f32 %v1004_v41, %v1034_v46  ;;  %v1014_v53 = vadd.f32 %v1013_v43, %v901_v30  ;;  %3752 = vmatprep.subr.bf16.mxu0 %v3751_v23  ;;  %v1099_v36 = vpop.permute.xlu1 %1098 }
 0x278   : > { %v1037_v57 = vmul.f32 0.2, %v1019_v55  ;;  %v4832_v41 = vsel %vm900_vm2, %v1097_v34, %v1099_v36 }
 0x279   : > { %v3436_v47 = vpop.f32.mrb[6].mxu1  ;;  %1175 = vmatmul.mubr.f32.gmra.mrb[10].mxu0 %v1041_v44  ;;  %v1036_v56 = vmul.f32 0.2, %v1014_v53 }
 0x27a   : > { %v1023_v49 = vpop.f32.mrb[7].mxu1  ;;  %1180 = vmatprep.mubr.f32.mxu0 %v4238_v48  ;;  %v1045_v60 = vmax.f32 %v1019_v55, %v1037_v57  ;;  %v1029_v61 = vadd.f32 %v3436_v47, %v901_v30  ;;  %3754 = vmatpush3.bf16.msra.mxu0 %v3751_v23 }
 0x27b   : > { %v1044_v58 = vmax.f32 %v1014_v53, %v1036_v56  ;;  %v1024_v59 = vadd.f32 %v1023_v49, %v901_v30  ;;  %3756 = vmatprep.subr.bf16.mxu0 %v3755_v26  ;;  %v3759_v30 = vpack.c.bf16 %v1425_v29, %v1424_v27 }
 0x27c   : > { %v1039_v63 = vmul.f32 0.2, %v1029_v61 }
 0x27d   : > { %1181 = vmatmul.mubr.f32.gmra.mrb[12].mxu0 %v1042_v52  ;;  %v1038_v62 = vmul.f32 0.2, %v1024_v59 }
 0x27e   : > { %1186 = vmatprep.mubr.f32.mxu0 %v4238_v48  ;;  %v1047_v1 = vmax.f32 %v1029_v61, %v1039_v63  ;;  %3758 = vmatpush3.bf16.msra.mxu0 %v3755_v26 }
 0x27f   : > { %v1046_v0 = vmax.f32 %v1024_v59, %v1038_v62  ;;  %3760 = vmatprep.subr.bf16.mxu0 %v3759_v30 }
 0x281   : > { %1187 = vmatmul.mubr.f32.gmra.mrb[14].mxu0 %v1043_v54 }
 0x282   : > { %1192 = vmatprep.mubr.f32.mxu0 %v4238_v48  ;;  %3762 = vmatpush3.bf16.msra.mxu0 %v3759_v30 }
 0x283   : > { %3764 = vmatprep.subr.bf16.mxu0 %v3763_v33 }
 0x285   : > { %1193 = vmatmul.mubr.f32.gmra.mrb[16].mxu0 %v1044_v58 }
 0x286   : > { %1198 = vmatprep.mubr.f32.mxu0 %v4238_v48  ;;  %3766 = vmatpush3.bf16.msra.mxu0 %v3763_v33 }
 0x289   : > { %1199 = vmatmul.mubr.f32.gmra.mrb[18].mxu0 %v1045_v60 }
 0x28a   : > { %1204 = vmatprep.mubr.f32.mxu0 %v4238_v48 }
 0x28d   : > { %1205 = vmatmul.mubr.f32.gmra.mrb[20].mxu0 %v1046_v0 }
 0x28e   : > { %1210 = vmatprep.mubr.f32.mxu0 %v4238_v48 }
 0x291   : > { %1211 = vmatmul.mubr.f32.gmra.mrb[22].mxu0 %v1047_v1 }
 0x348   : > { %v1170_v40 = vpop.f32.mrb[8].mxu0 }
 0x349   : > { %v1171_v42 = vadd.f32 %v1170_v40, %v4829_v39  ;;  %v1172_v43 = vpop.f32.mrb[9].mxu0 }
 0x34a   : > { %v1173_v44 = vadd.f32 %v1172_v43, %v4832_v41 }
 0x34b   : > { %v1217_v45 = vmul.f32 0.2, %v1171_v42 }
 0x34c   : > { %v1218_v46 = vmul.f32 0.2, %v1173_v44  ;;  %v1176_v47 = vpop.f32.mrb[10].mxu0 }
 0x34d   : > { %v1177_v49 = vadd.f32 %v1176_v47, %v4829_v39  ;;  %v1178_v51 = vpop.f32.mrb[11].mxu0  ;;  %v1233_v54 = vmax.f32 %v1171_v42, %v1217_v45 }
 0x34e   : > { %v1234_v52 = vmax.f32 %v1173_v44, %v1218_v46  ;;  %v1179_v53 = vadd.f32 %v1178_v51, %v4832_v41  ;;  %v1550_v51 = vld [vmem:[%s704_s11 + $0x10] sm:$0xff] }
 0x34f   : > { %v1219_v55 = vmul.f32 0.2, %v1177_v49 }
 0x350   : > { %v1220_v56 = vmul.f32 0.2, %v1179_v53  ;;  %v1182_v57 = vpop.f32.mrb[12].mxu0  ;;  %1361 = vmatprep.mubr.f32.mxu1 %v1234_v52  ;;  %v1552_v52 = vld [vmem:[%s704_s11 + $0x20] sm:$0xff] }
 0x351   : > { %v1183_v58 = vadd.f32 %v1182_v57, %v4829_v39  ;;  %v1184_v59 = vpop.f32.mrb[13].mxu0  ;;  %1362 = vmatmul.mubr.f32.vlgmr.msra.gmra.mrb[8].mxu1 %v1233_v54  ;;  %v1235_v62 = vmax.f32 %v1177_v49, %v1219_v55  ;;  %v1548_v49 = vld [vmem:[%s704_s11] sm:$0xff]  ;;  %v1554_v54 = vld [vmem:[%s704_s11 + $0x30] sm:$0xff]  ;;  %v1555_v55 = vld [vmem:[%s704_s11 + $0x38] sm:$0xff] }
 0x352   : > { %v1236_v60 = vmax.f32 %v1179_v53, %v1220_v56  ;;  %v1185_v61 = vadd.f32 %v1184_v59, %v4832_v41  ;;  %3482 = vmatpush3.msk.msra.mxu1 %vm753_vm0, %v1556_v14  ;;  %v1553_v53 = vld [vmem:[%s704_s11 + $0x28] sm:$0xff]  ;;  %v1428_v56 = vld [vmem:[%s5360_s6 + $0x50] sm:$0xff]  ;;  %v1429_v57 = vld [vmem:[%s5360_s6 + $0x58] sm:$0xff] }
 0x353   : > { %v1221_v63 = vmul.f32 0.2, %v1183_v58  ;;  %v1430_v59 = vld [vmem:[%s5360_s6 + $0x60] sm:$0xff] }
 0x354   : > { %v1222_v0 = vmul.f32 0.2, %v1185_v61  ;;  %v1188_v1 = vpop.f32.mrb[14].mxu0  ;;  %1366 = vmatprep.mubr.f32.mxu1 %v1236_v60  ;;  %v1431_v60 = vld [vmem:[%s5360_s6 + $0x68] sm:$0xff] }
 0x355   : > { %v1189_v2 = vadd.f32 %v1188_v1, %v4829_v39  ;;  %v1190_v3 = vpop.f32.mrb[15].mxu0  ;;  %1367 = vmatmul.mubr.f32.gmra.mrb[10].mxu1 %v1235_v62  ;;  %v1237_v6 = vmax.f32 %v1183_v58, %v1221_v63  ;;  %v3767_v58 = vpack.c.bf16 %v1429_v57, %v1428_v56  ;;  %v1432_v62 = vld [vmem:[%s5360_s6 + $0x70] sm:$0xff]  ;;  %v1433_v63 = vld [vmem:[%s5360_s6 + $0x78] sm:$0xff] }
 0x356   : > { %v1238_v4 = vmax.f32 %v1185_v61, %v1222_v0  ;;  %v1191_v5 = vadd.f32 %v1190_v3, %v4832_v41  ;;  %v3771_v61 = vpack.c.bf16 %v1431_v60, %v1430_v59  ;;  %v3775_v0 = vpack.c.bf16 %v1433_v63, %v1432_v62  ;;  %v1712_v1 = vld [vmem:[#allocation7] sm:$0xff] }
 0x357   : > { %v1223_v7 = vmul.f32 0.2, %v1189_v2  ;;  %3768 = vmatprep.subr.bf16.mxu0 %v3767_v58 }
 0x358   : > { %v1224_v8 = vmul.f32 0.2, %v1191_v5  ;;  %v1194_v9 = vpop.f32.mrb[16].mxu0  ;;  %1371 = vmatprep.mubr.f32.mxu1 %v1238_v4  ;;  %3770 = vmatpush3.bf16.msra.mxu0 %v3767_v58  ;;  %v1720_v4 = vld [vmem:[%s5367_s13] sm:$0x3] }
 0x359   : > { %v1195_v10 = vadd.f32 %v1194_v9, %v4829_v39  ;;  %v1196_v11 = vpop.f32.mrb[17].mxu0  ;;  %1372 = vmatmul.mubr.f32.gmra.mrb[12].mxu1 %v1237_v6  ;;  %v1239_v14 = vmax.f32 %v1189_v2, %v1223_v7  ;;  %3772 = vmatprep.subr.bf16.mxu0 %v3771_v61  ;;  %v1713_v2 = vld [vmem:[#allocation7 + $0x8] sm:$0xff]  ;;  %v1725_v6 = vrot.slane %v1720_v4, %v4588_v37 }
 0x35a   : > { %v1240_v12 = vmax.f32 %v1191_v5, %v1224_v8  ;;  %v1197_v13 = vadd.f32 %v1196_v11, %v4832_v41  ;;  %v3779_v3 = vpack.c.bf16 %v1713_v2, %v1712_v1  ;;  %v4888_v5 = vld [vmem:[%s5367_s13 + $0x1] sm:$0x7]  ;;  %v1729_v7 = vrot.slane %v1720_v4, %v4591_v38 }
 0x35b   : > { %v1225_v15 = vmul.f32 0.2, %v1195_v10  ;;  %1730 = vrot.lane.b32.xlu1 %v1725_v6, %s4237_s21  ;;  %v1922_v8 = vrot.slane %v4888_v5, %v4591_v38  ;;  %v1918_v9 = vrot.slane %v4888_v5, %v4588_v37 }
 0x35c   : > { %v1226_v16 = vmul.f32 0.2, %v1197_v13  ;;  %v1200_v17 = vpop.f32.mrb[18].mxu0  ;;  %1376 = vmatprep.mubr.f32.mxu1 %v1240_v12  ;;  %3774 = vmatpush3.bf16.msra.mxu0 %v3771_v61  ;;  %v3088_v12 = vld [vmem:[%s5361_s7 + $0x4] ss:$0 sm:$0xff] }
 0x35d   : > { %v1201_v18 = vadd.f32 %v1200_v17, %v4829_v39  ;;  %v1202_v19 = vpop.f32.mrb[19].mxu0  ;;  %1377 = vmatmul.mubr.f32.gmra.mrb[14].mxu1 %v1239_v14  ;;  %v1241_v22 = vmax.f32 %v1195_v10, %v1225_v15  ;;  %3776 = vmatprep.subr.bf16.mxu0 %v3775_v0  ;;  %v4902_v10 = vld [vmem:[%s5367_s13 + $0x3] sm:$0x3]  ;;  %v1294_v14 = vpop.permute.xlu0 %1293 }
 0x35e   : > { %v1242_v20 = vmax.f32 %v1197_v13, %v1226_v16  ;;  %v1203_v21 = vadd.f32 %v1202_v19, %v4832_v41  ;;  %1732 = vrot.lane.b32.xlu0 %v1729_v7, %s4237_s21  ;;  %v2123_v11 = vrot.slane %v4902_v10, %v4591_v38  ;;  %v1292_v13 = vpop.permute.xlu1 %1291 }
 0x35f   : > { %v1227_v23 = vmul.f32 0.2, %v1201_v18  ;;  %1929 = vrot.lane.b32.xlu1 %v1922_v8, %s4237_s21  ;;  %v4913_v17 = vsel %vm900_vm2, %v1292_v13, %v1294_v14 }
 0x360   : > { %v1228_v24 = vmul.f32 0.2, %v1203_v21  ;;  %v1206_v25 = vpop.f32.mrb[20].mxu0  ;;  %1381 = vmatprep.mubr.f32.mxu1 %v1242_v20  ;;  %3778 = vmatpush3.bf16.msra.mxu0 %v3775_v0 }
 0x361   : > { %v1207_v26 = vadd.f32 %v1206_v25, %v4829_v39  ;;  %v1208_v27 = vpop.f32.mrb[21].mxu0  ;;  %1382 = vmatmul.mubr.f32.gmra.mrb[16].mxu1 %v1241_v22  ;;  %v1243_v31 = vmax.f32 %v1201_v18, %v1227_v23  ;;  %3780 = vmatprep.subr.bf16.mxu0 %v3779_v3 }
 0x362   : > { %v1244_v29 = vmax.f32 %v1203_v21, %v1228_v24  ;;  %v1209_v30 = vadd.f32 %v1208_v27, %v4832_v41  ;;  %v1714_v27 = vld [vmem:[#allocation7 + $0x10] sm:$0xff] }
 0x363   : > { %v1229_v32 = vmul.f32 0.2, %v1207_v26  ;;  %1927 = vrot.lane.b32.xlu1 %v1918_v9, %s4237_s21 }
 0x364   : > { %v1230_v33 = vmul.f32 0.2, %v1209_v30  ;;  %v1212_v34 = vpop.f32.mrb[22].mxu0  ;;  %1386 = vmatprep.mubr.f32.mxu1 %v1244_v29  ;;  %v1715_v29 = vld [vmem:[#allocation7 + $0x18] sm:$0xff] }
 0x365   : > { %v1213_v35 = vadd.f32 %v1212_v34, %v4829_v39  ;;  %v1214_v36 = vpop.f32.mrb[23].mxu0  ;;  %1387 = vmatmul.mubr.f32.gmra.mrb[18].mxu1 %v1243_v31  ;;  %v1245_v43 = vmax.f32 %v1207_v26, %v1229_v32  ;;  %v1549_v39 = vld [vmem:[%s704_s11 + $0x8] sm:$0xff] }
 0x366   : > { %v1246_v40 = vmax.f32 %v1209_v30, %v1230_v33  ;;  %v1215_v42 = vadd.f32 %v1214_v36, %v4832_v41  ;;  %v1551_v41 = vld [vmem:[%s704_s11 + $0x18] sm:$0xff]  ;;  %s5412_s11 = sld [smem:[#allocation23_spill]] }
 0x367   : > { %v1231_v44 = vmul.f32 0.2, %v1213_v35  ;;  %2126 = vrot.lane.b32.xlu1 %v2123_v11, %s4237_s21  ;;  %v3089_v11 = vld [vmem:[%s5367_s13] ss:$0 sm:$0xff] }
 0x368   : > { %v1232_v45 = vmul.f32 0.2, %v1215_v42  ;;  %1391 = vmatprep.mubr.f32.mxu1 %v1246_v40  ;;  %v1716_v40 = vld [vmem:[#allocation7 + $0x20] sm:$0xff] }
 0x369   : > { %1392 = vmatmul.mubr.f32.gmra.mrb[20].mxu1 %v1245_v43  ;;  %v1247_v47 = vmax.f32 %v1213_v35, %v1231_v44  ;;  %v3783_v35 = vpack.c.bf16 %v1715_v29, %v1714_v27 }
 0x36a   : > { %v1248_v46 = vmax.f32 %v1215_v42, %v1232_v45  ;;  %v1717_v42 = vld [vmem:[#allocation7 + $0x28] sm:$0xff] }
 0x36b   : > { %1440 = vrot.lane.b32.xlu1 %v3088_v12, %s4237_s21 }
 0x36c   : > { %1396 = vmatprep.mubr.f32.mxu1 %v1248_v46 }
 0x36d   : > { %1397 = vmatmul.mubr.f32.gmra.mrb[22].mxu1 %v1247_v47 }
 0x36e   : > { %3483 = vmatprep.mubr.msk.f32.mxu1 %vm728_vm1, %v1548_v49  ;;  %v3787_v49 = vpack.c.bf16 %v1717_v42, %v1716_v40 }
 0x371   : > { %3484 = vmatmul.mubr.msk.f32.vlgmr.msra.gmra.mrb[24].mxu1 %vm728_vm1, %v1549_v39 }
 0x372   : > { %3486 = vmatprep.mubr.msk.f32.mxu1 %vm728_vm1, %v1550_v51  ;;  %v1718_v51 = vld [vmem:[#allocation7 + $0x30] sm:$0xff] }
 0x375   : > { %3487 = vmatmul.mubr.msk.f32.gmra.mrb[26].mxu1 %vm728_vm1, %v1551_v41  ;;  %v1719_v41 = vld [vmem:[#allocation7 + $0x38] sm:$0xff] }
 0x376   : > { %3489 = vmatprep.mubr.msk.f32.mxu1 %vm728_vm1, %v1552_v52  ;;  %v3791_v57 = vpack.c.bf16 %v1719_v41, %v1718_v51 }
 0x379   : > { %3490 = vmatmul.mubr.msk.f32.gmra.mrb[28].mxu1 %vm728_vm1, %v1553_v53 }
 0x37a   : > { %3492 = vmatprep.mubr.msk.f32.mxu1 %vm728_vm1, %v1554_v54 }
 0x37d   : > { %3493 = vmatmul.mubr.msk.f32.gmra.mrb[30].mxu1 %vm728_vm1, %v1555_v55 }
 0x37e   : > { %2001 = vmatprep.mubr.f32.mxu1 %v4238_v48 }
 0x424   : > { %v3186_v15 = vpop.f32.mrb[8].mxu1 }
 0x425   : > { %v3187_v16 = vpop.f32.mrb[9].mxu1 }
 0x426   : > { %v3188_v18 = vadd.f32 %v3187_v16, %v3186_v15 }
 0x428   : > { %v3189_v19 = vpop.f32.mrb[10].mxu1  ;;  %v1364_v20 = vadd.f32 %v3188_v18, %v4913_v17 }
 0x429   : > { %v3190_v38 = vpop.f32.mrb[11].mxu1 }
 0x42a   : > { %v3191_v21 = vadd.f32 %v3190_v38, %v3189_v19  ;;  %v1402_v22 = vmul.f32 0.2, %v1364_v20 }
 0x42c   : > { %v1369_v23 = vadd.f32 %v3191_v21, %v4913_v17  ;;  %v3192_v24 = vpop.f32.mrb[12].mxu1  ;;  %v1410_v25 = vmax.f32 %v1364_v20, %v1402_v22 }
 0x42d   : > { %v3193_v26 = vpop.f32.mrb[13].mxu1 }
 0x42e   : > { %v1403_v30 = vmul.f32 0.2, %v1369_v23  ;;  %v3194_v31 = vadd.f32 %v3193_v26, %v3192_v24  ;;  %3469 = vmatprep.mubr.f32.mxu0 %v1410_v25 }
 0x430   : > { %v1411_v32 = vmax.f32 %v1369_v23, %v1403_v30  ;;  %v1374_v33 = vadd.f32 %v3194_v31, %v4913_v17  ;;  %v3195_v34 = vpop.f32.mrb[14].mxu1 }
 0x431   : > { %v3196_v36 = vpop.f32.mrb[15].mxu1 }
 0x432   : > { %v1404_v43 = vmul.f32 0.2, %v1374_v33  ;;  %v3197_v44 = vadd.f32 %v3196_v36, %v3195_v34  ;;  %3470 = vmatmul.mubr.f32.vlgmr.msra.gmra.mrb[24].mxu0 %v1411_v32 }
 0x433   : > { %3782 = vmatpush3.bf16.msra.mxu0 %v3779_v3 }
 0x434   : > { %v1379_v45 = vadd.f32 %v3197_v44, %v4913_v17  ;;  %v3198_v46 = vpop.f32.mrb[16].mxu1  ;;  %v1412_v47 = vmax.f32 %v1374_v33, %v1404_v43  ;;  %3784 = vmatprep.subr.bf16.mxu0 %v3783_v35 }
 0x435   : > { %v3199_v39 = vpop.f32.mrb[17].mxu1 }
 0x436   : > { %v1405_v52 = vmul.f32 0.2, %v1379_v45  ;;  %v3200_v53 = vadd.f32 %v3199_v39, %v3198_v46  ;;  %3472 = vmatprep.mubr.f32.mxu0 %v1412_v47 }
 0x437   : > { %3786 = vmatpush3.bf16.msra.mxu0 %v3783_v35 }
 0x438   : > { %v1384_v54 = vadd.f32 %v3200_v53, %v4913_v17  ;;  %v3201_v55 = vpop.f32.mrb[18].mxu1  ;;  %v1413_v56 = vmax.f32 %v1379_v45, %v1405_v52  ;;  %3788 = vmatprep.subr.bf16.mxu0 %v3787_v49  ;;  %v1882_v52 = vld [vmem:[%s5364_s10 + $0x8] sm:$0xff]  ;;  %v1884_v53 = vld [vmem:[%s5364_s10 + $0x18] sm:$0xff] }
 0x439   : > { %v3202_v58 = vpop.f32.mrb[19].mxu1 }
 0x43a   : > { %v1406_v59 = vmul.f32 0.2, %v1384_v54  ;;  %v3203_v60 = vadd.f32 %v3202_v58, %v3201_v55  ;;  %3473 = vmatmul.mubr.f32.gmra.mrb[26].mxu0 %v1413_v56  ;;  %v1881_v55 = vld [vmem:[%s5364_s10] sm:$0xff]  ;;  %v1883_v56 = vld [vmem:[%s5364_s10 + $0x10] sm:$0xff]  ;;  %v1886_v58 = vld [vmem:[%s5364_s10 + $0x28] sm:$0xff] }
 0x43b   : > { %3790 = vmatpush3.bf16.msra.mxu0 %v3787_v49 }
 0x43c   : > { %v1389_v61 = vadd.f32 %v3203_v60, %v4913_v17  ;;  %v3204_v62 = vpop.f32.mrb[20].mxu1  ;;  %v1414_v63 = vmax.f32 %v1384_v54, %v1406_v59  ;;  %3792 = vmatprep.subr.bf16.mxu0 %v3791_v57  ;;  %v3795_v54 = vpack.c.bf16 %v1884_v53, %v1882_v52  ;;  %v1888_v59 = vld [vmem:[%s5364_s10 + $0x38] sm:$0xff]  ;;  %v2103_v52 = vld [vmem:[%s5408_s3 + $0xa8] sm:$0xff] }
 0x43d   : > { %v3205_v0 = vpop.f32.mrb[21].mxu1  ;;  %v3799_v60 = vpack.c.bf16 %v1888_v59, %v1886_v58  ;;  %v2105_v58 = vld [vmem:[%s5408_s3 + $0xb8] sm:$0xff] }
 0x43e   : > { %v1407_v1 = vmul.f32 0.2, %v1389_v61  ;;  %v3206_v2 = vadd.f32 %v3205_v0, %v3204_v62  ;;  %3475 = vmatprep.mubr.f32.mxu0 %v1414_v63  ;;  %3796 = vmatprep.subr.bf16.mxu1 %v3795_v54  ;;  %v1887_v62 = vld [vmem:[%s5364_s10 + $0x30] sm:$0xff]  ;;  %v1890_v0 = vld [vmem:[%s5364_s10 + $0x48] sm:$0xff] }
 0x43f   : > { %3794 = vmatpush3.bf16.msra.mxu0 %v3791_v57  ;;  %v3797_v57 = vpack.c.bf16 %v1883_v56, %v1881_v55  ;;  %v2086_v55 = vld [vmem:[%s5408_s3 + $0x20] sm:$0xff]  ;;  %v2087_v56 = vld [vmem:[%s5408_s3 + $0x28] sm:$0xff] }
 0x440   : > { %v1394_v3 = vadd.f32 %v3206_v2, %v4913_v17  ;;  %v3207_v4 = vpop.f32.mrb[22].mxu1  ;;  %v1415_v6 = vmax.f32 %v1389_v61, %v1407_v1  ;;  %v1885_v61 = vld [vmem:[%s5364_s10 + $0x20] sm:$0xff]  ;;  %v1892_v1 = vld [vmem:[%s5364_s10 + $0x58] sm:$0xff]  ;;  %v3837_v59 = vpack.c.bf16 %v2087_v56, %v2086_v55 }
 0x441   : > { %v3208_v7 = vpop.f32.mrb[23].mxu1  ;;  %3798 = vmatpush1.bf16.msra.mxu1 %v3797_v57  ;;  %v3801_v63 = vpack.c.bf16 %v1887_v62, %v1885_v61  ;;  %v3803_v2 = vpack.c.bf16 %v1892_v1, %v1890_v0  ;;  %v2104_v57 = vld [vmem:[%s5408_s3 + $0xb0] sm:$0xff]  ;;  %v2089_v62 = vld [vmem:[%s5408_s3 + $0x38] sm:$0xff]  ;;  %v2107_v0 = vld [vmem:[%s5408_s3 + $0xc8] sm:$0xff] }
 0x442   : > { %v1408_v8 = vmul.f32 0.2, %v1394_v3  ;;  %v3209_v9 = vadd.f32 %v3208_v7, %v3207_v4  ;;  %3476 = vmatmul.mubr.f32.gmra.mrb[28].mxu0 %v1415_v6  ;;  %3800 = vmatprep.subr.bf16.mxu1 %v3799_v60  ;;  %v1891_v4 = vld [vmem:[%s5364_s10 + $0x50] sm:$0xff]  ;;  %v1894_v7 = vld [vmem:[%s5364_s10 + $0x68] sm:$0xff]  ;;  %v3839_v60 = vpack.c.bf16 %v2105_v58, %v2104_v57  ;;  %v2110_v58 = vld [vmem:[%s5408_s3 + $0xe0] sm:$0xff] }
 0x443   : > { %v2088_v61 = vld [vmem:[%s5408_s3 + $0x30] sm:$0xff] }
 0x444   : > { %v1399_v12 = vadd.f32 %v3209_v9, %v4913_v17  ;;  %v3485_v13 = vpop.f32.mrb[24].mxu1  ;;  %v1416_v14 = vmax.f32 %v1394_v3, %v1408_v8  ;;  %v1889_v3 = vld [vmem:[%s5364_s10 + $0x40] sm:$0xff]  ;;  %v1896_v8 = vld [vmem:[%s5364_s10 + $0x78] sm:$0xff]  ;;  %v3841_v1 = vpack.c.bf16 %v2089_v62, %v2088_v61  ;;  %v2095_v62 = vld [vmem:[%s5408_s3 + $0x68] sm:$0xff] }
 0x445   : > { %v1663_v15 = vadd.f32 %v3485_v13, %v3089_v11  ;;  %v1657_v16 = vpop.f32.mrb[25].mxu1  ;;  %3802 = vmatpush1.bf16.msra.mxu1 %v3801_v63  ;;  %v3805_v6 = vpack.c.bf16 %v1891_v4, %v1889_v3  ;;  %v3807_v9 = vpack.c.bf16 %v1896_v8, %v1894_v7  ;;  %v2106_v63 = vld [vmem:[%s5408_s3 + $0xc0] sm:$0xff]  ;;  %v2091_v4 = vld [vmem:[%s5408_s3 + $0x48] sm:$0xff]  ;;  %v2109_v7 = vld [vmem:[%s5408_s3 + $0xd8] sm:$0xff] }
 0x446   : > { %v1409_v18 = vmul.f32 0.2, %v1399_v12  ;;  %v1658_v19 = vadd.f32 %v3089_v11, %v1657_v16  ;;  %3478 = vmatprep.mubr.f32.mxu0 %v1416_v14  ;;  %3804 = vmatprep.subr.bf16.mxu1 %v3803_v2  ;;  %v1898_v14 = vld [vmem:[%s5364_s10 + $0x88] sm:$0xff]  ;;  %v3843_v2 = vpack.c.bf16 %v2107_v0, %v2106_v63  ;;  %v2090_v3 = vld [vmem:[%s5408_s3 + $0x40] sm:$0xff]  ;;  %v2112_v63 = vld [vmem:[%s5408_s3 + $0xf0] sm:$0xff] }
 0x447   : > { %v1697_v20 = vmul.f32 0.2, %v1663_v15  ;;  %v3845_v8 = vpack.c.bf16 %v2091_v4, %v2090_v3  ;;  %v2094_v61 = vld [vmem:[%s5408_s3 + $0x60] sm:$0xff]  ;;  %v2113_v0 = vld [vmem:[%s5408_s3 + $0xf8] sm:$0xff] }
 0x448   : > { %v1696_v38 = vmul.f32 0.2, %v1658_v19  ;;  %v3488_v21 = vpop.f32.mrb[26].mxu1  ;;  %v1417_v22 = vmax.f32 %v1399_v12, %v1409_v18  ;;  %v1895_v12 = vld [vmem:[%s5364_s10 + $0x70] sm:$0xff]  ;;  %v1897_v18 = vld [vmem:[%s5364_s10 + $0x80] sm:$0xff]  ;;  %v2097_v3 = vld [vmem:[%s5408_s3 + $0x78] sm:$0xff] }
 0x449   : > { %v1673_v23 = vadd.f32 %v3488_v21, %v3089_v11  ;;  %v1667_v24 = vpop.f32.mrb[27].mxu1  ;;  %v1705_v29 = vmax.f32 %v1663_v15, %v1697_v20  ;;  %3806 = vmatpush1.bf16.msra.mxu1 %v3805_v6  ;;  %v1900_v15 = vld [vmem:[%s5364_s10 + $0x98] sm:$0xff]  ;;  %v2108_v6 = vld [vmem:[%s5408_s3 + $0xd0] sm:$0xff] }
 0x44a   : > { %v1704_v25 = vmax.f32 %v1658_v19, %v1696_v38  ;;  %3479 = vmatmul.mubr.f32.gmra.mrb[30].mxu0 %v1417_v22  ;;  %v1668_v26 = vadd.f32 %v3089_v11, %v1667_v24  ;;  %3808 = vmatprep.subr.bf16.mxu1 %v3807_v9  ;;  %v3811_v16 = vpack.c.bf16 %v1900_v15, %v1898_v14  ;;  %v1899_v19 = vld [vmem:[%s5364_s10 + $0x90] sm:$0xff]  ;;  %v1902_v38 = vld [vmem:[%s5364_s10 + $0xa8] sm:$0xff]  ;;  %v1904_v21 = vld [vmem:[%s5364_s10 + $0xb8] sm:$0xff] }
 0x44b   : > { %v1699_v27 = vmul.f32 0.2, %v1673_v23  ;;  %v3813_v20 = vpack.c.bf16 %v1899_v19, %v1897_v18  ;;  %v3815_v22 = vpack.c.bf16 %v1904_v21, %v1902_v38  ;;  %v1903_v24 = vld [vmem:[%s5364_s10 + $0xb0] sm:$0xff]  ;;  %v3847_v9 = vpack.c.bf16 %v2109_v7, %v2108_v6  ;;  %v1733_v21 = vpop.permute.xlu0 %1732  ;;  %v2251_v7 = vld [vmem:[%s5409_s22] sm:$0xff] }
 0x44c   : > { %v1698_v30 = vmul.f32 0.2, %v1668_v26  ;;  %3511 = vmatprep.mubr.msk.f32.mxu0 %vm900_vm2, %v1704_v25  ;;  %v3491_v17 = vpop.f32.mrb[28].mxu1  ;;  %v2119_v6 = vrot.slane %v4902_v10, %v4588_v37  ;;  %v2255_v10 = vld [vmem:[%s5409_s22 + $0x20] sm:$0xff] }
 0x44d   : > { %v1683_v31 = vadd.f32 %v3491_v17, %v3089_v11  ;;  %v1677_v32 = vpop.f32.mrb[29].mxu1  ;;  %v1707_v33 = vmax.f32 %v1673_v23, %v1699_v27  ;;  %v1901_v23 = vld [vmem:[%s5364_s10 + $0xa0] sm:$0xff]  ;;  %v1908_v27 = vld [vmem:[%s5364_s10 + $0xd8] sm:$0xff]  ;;  %v1907_v17 = vld [vmem:[%s5364_s10 + $0xd0] sm:$0xff] }
 0x44e   : > { %v1706_v34 = vmax.f32 %v1668_v26, %v1698_v30  ;;  %v1678_v35 = vadd.f32 %v3089_v11, %v1677_v32  ;;  %3512 = vmatmul.mubr.msk.f32.vlgmr.msra.gmra.mrb[32].mxu0 %vm900_vm2, %v1705_v29  ;;  %v3817_v25 = vpack.c.bf16 %v1903_v24, %v1901_v23  ;;  %v1906_v26 = vld [vmem:[%s5364_s10 + $0xc8] sm:$0xff]  ;;  %v1905_v30 = vld [vmem:[%s5364_s10 + $0xc0] sm:$0xff]  ;;  %v1731_v23 = vpop.permute.xlu1 %1730 }
 0x44f   : > { %v1701_v36 = vmul.f32 0.2, %v1683_v31  ;;  %v3819_v29 = vpack.c.bf16 %v1908_v27, %v1906_v26  ;;  %v1910_v32 = vld [vmem:[%s5364_s10 + $0xe8] sm:$0xff]  ;;  %v1734_v24 = vsel %vm900_vm2, %v1731_v23, %v1733_v21  ;;  %v2257_v23 = vld [vmem:[%s5409_s22 + $0x30] sm:$0xff] }
 0x450   : > { %v1700_v40 = vmul.f32 0.2, %v1678_v35  ;;  %v3494_v42 = vpop.f32.mrb[30].mxu1  ;;  %3514 = vmatprep.mubr.msk.f32.mxu0 %vm900_vm2, %v1706_v34 }
 0x451   : > { %v1693_v43 = vadd.f32 %v3494_v42, %v3089_v11  ;;  %v1687_v44 = vpop.f32.mrb[31].mxu1  ;;  %v1709_v45 = vmax.f32 %v1683_v31, %v1701_v36  ;;  %v3821_v31 = vpack.c.bf16 %v1907_v17, %v1905_v30  ;;  %v1911_v36 = vld [vmem:[%s5364_s10 + $0xf0] sm:$0xff]  ;;  %v1926_v42 = vrot.slane %v4888_v5, %v1092_v50  ;;  %v2101_v50 = vld [vmem:[%s5408_s3 + $0x98] sm:$0xff] }
 0x452   : > { %v1708_v46 = vmax.f32 %v1678_v35, %v1700_v40  ;;  %v1688_v47 = vadd.f32 %v3089_v11, %v1687_v44  ;;  %3515 = vmatmul.mubr.msk.f32.gmra.mrb[34].mxu0 %vm900_vm2, %v1707_v33  ;;  %v1893_v11 = vld [vmem:[%s5364_s10 + $0x60] sm:$0xff]  ;;  %v1912_v33 = vld [vmem:[%s5364_s10 + $0xf8] sm:$0xff]  ;;  %v2099_v44 = vld [vmem:[%s5408_s3 + $0x88] sm:$0xff] }
 0x453   : > { %v1703_v49 = vmul.f32 0.2, %v1693_v43  ;;  %v3809_v13 = vpack.c.bf16 %v1895_v12, %v1893_v11  ;;  %v3823_v34 = vpack.c.bf16 %v1912_v33, %v1910_v32  ;;  %v1909_v35 = vld [vmem:[%s5364_s10 + $0xe0] sm:$0xff]  ;;  %1931 = vrot.lane.b32.xlu0 %v1926_v42, %s4237_s21  ;;  %v2092_v11 = vld [vmem:[%s5408_s3 + $0x50] sm:$0xff]  ;;  %v2093_v12 = vld [vmem:[%s5408_s3 + $0x58] sm:$0xff] }
 0x454   : > { %v1702_v39 = vmul.f32 0.2, %v1688_v47  ;;  %3517 = vmatprep.mubr.msk.f32.mxu0 %vm900_vm2, %v1708_v46  ;;  %v3825_v40 = vpack.c.bf16 %v1911_v36, %v1909_v35 }
 0x455   : > { %v1711_v51 = vmax.f32 %v1693_v43, %v1703_v49  ;;  %3810 = vmatpush1.bf16.msra.mxu1 %v3809_v13  ;;  %v2098_v43 = vld [vmem:[%s5408_s3 + $0x80] sm:$0xff]  ;;  %v3831_v49 = vpack.c.bf16 %v2101_v50, %v2100_v28  ;;  %v3849_v13 = vpack.c.bf16 %v2093_v12, %v2092_v11  ;;  %v2254_v12 = vld [vmem:[%s5409_s22 + $0x18] sm:$0xff] }
 0x456   : > { %v1710_v41 = vmax.f32 %v1688_v47, %v1702_v39  ;;  %3518 = vmatmul.mubr.msk.f32.gmra.mrb[36].mxu0 %vm900_vm2, %v1709_v45  ;;  %3812 = vmatprep.subr.bf16.mxu1 %v3811_v16  ;;  %v2082_v45 = vld [vmem:[%s5408_s3] sm:$0xff]  ;;  %v3827_v46 = vpack.c.bf16 %v2099_v44, %v2098_v43  ;;  %v2083_v47 = vld [vmem:[%s5408_s3 + $0x8] sm:$0xff]  ;;  %v2084_v39 = vld [vmem:[%s5408_s3 + $0x10] sm:$0xff] }
 0x457   : > { %v3829_v5 = vpack.c.bf16 %v2083_v47, %v2082_v45  ;;  %2124 = vrot.lane.b32.xlu0 %v2119_v6, %s4237_s21 }
 0x458   : > { %3520 = vmatprep.mubr.msk.f32.mxu0 %vm900_vm2, %v1710_v41  ;;  %v2102_v41 = vld [vmem:[%s5408_s3 + $0xa0] sm:$0xff]  ;;  %3828 = vmatprep.subr.bf16.mxu0 %v3827_v46 }
 0x459   : > { %3814 = vmatpush1.bf16.msra.mxu1 %v3813_v20  ;;  %3830 = vmatpush3.bf16.msra.mxu0 %v3829_v5  ;;  %v3835_v54 = vpack.c.bf16 %v2103_v52, %v2102_v41 }
 0x45a   : > { %3521 = vmatmul.mubr.msk.f32.gmra.mrb[38].mxu0 %vm900_vm2, %v1711_v51  ;;  %3816 = vmatprep.subr.bf16.mxu1 %v3815_v22  ;;  %v2085_v51 = vld [vmem:[%s5408_s3 + $0x18] sm:$0xff] }
 0x45b   : > { %v3833_v53 = vpack.c.bf16 %v2085_v51, %v2084_v39  ;;  %3832 = vmatprep.subr.bf16.mxu0 %v3831_v49 }
 0x45d   : > { %3818 = vmatpush1.bf16.msra.mxu1 %v3817_v25  ;;  %3834 = vmatpush3.bf16.msra.mxu0 %v3833_v53 }
 0x45e   : > { %3820 = vmatprep.subr.bf16.mxu1 %v3819_v29  ;;  %3836 = vmatprep.subr.bf16.mxu0 %v3835_v54 }
 0x461   : > { %3822 = vmatpush1.bf16.msra.mxu1 %v3821_v31  ;;  %3838 = vmatpush3.bf16.msra.mxu0 %v3837_v59  ;;  %v2111_v59 = vld [vmem:[%s5408_s3 + $0xe8] sm:$0xff] }
 0x462   : > { %3824 = vmatprep.subr.bf16.mxu1 %v3823_v34  ;;  %3840 = vmatprep.subr.bf16.mxu0 %v3839_v60  ;;  %v3851_v60 = vpack.c.bf16 %v2111_v59, %v2110_v58 }
 0x465   : > { %3826 = vmatpush1.bf16.msra.mxu1 %v3825_v40  ;;  %3842 = vmatpush3.bf16.msra.mxu0 %v3841_v1  ;;  %v3855_v1 = vpack.c.bf16 %v2113_v0, %v2112_v63 }
 0x466   : > { %3844 = vmatprep.subr.bf16.mxu0 %v3843_v2  ;;  %v2096_v2 = vld [vmem:[%s5408_s3 + $0x70] sm:$0xff] }
 0x467   : > { %v3857_v4 = vpack.c.bf16 %v2097_v3, %v2096_v2 }
 0x469   : > { %3846 = vmatpush3.bf16.msra.mxu0 %v3845_v8  ;;  %v2252_v8 = vld [vmem:[%s5409_s22 + $0x8] sm:$0xff] }
 0x46a   : > { %3848 = vmatprep.subr.bf16.mxu0 %v3847_v9  ;;  %v2253_v9 = vld [vmem:[%s5409_s22 + $0x10] sm:$0xff]  ;;  %v3859_v11 = vpack.c.bf16 %v2252_v8, %v2251_v7 }
 0x46b   : > { %v3863_v37 = vpack.c.bf16 %v2254_v12, %v2253_v9 }
 0x46c   : > { %3860 = vmatprep.subr.bf16.mxu1 %v3859_v11 }
 0x46d   : > { %3850 = vmatpush3.bf16.msra.mxu0 %v3849_v13  ;;  %v2256_v13 = vld [vmem:[%s5409_s22 + $0x28] sm:$0xff] }
 0x46e   : > { %3852 = vmatprep.subr.bf16.mxu0 %v3851_v60  ;;  %v3867_v21 = vpack.c.bf16 %v2256_v13, %v2255_v10 }
 0x505   : > { %v5106_v14 = vpop.f32.mrb[24].mxu0 }
 0x506   : > { %v5108_v15 = vpop.f32.mrb[25].mxu0 }
 0x50d   : > { %v5110_v16 = vpop.f32.mrb[26].mxu0 }
 0x50e   : > { %v5112_v18 = vpop.f32.mrb[27].mxu0 }
 0x515   : > { %v5114_v19 = vpop.f32.mrb[28].mxu0 }
 0x516   : > { %v5116_v20 = vpop.f32.mrb[29].mxu0 }
 0x51d   : > { %v5118_v38 = vpop.f32.mrb[30].mxu0 }
 0x51e   : > { %v5120_v22 = vpop.f32.mrb[31].mxu0 }
 0x521   : > { %v3513_v25 = vpop.f32.mrb[32].mxu0 }
 0x522   : > { %v1826_v26 = vpop.f32.mrb[33].mxu0  ;;  %v1832_v27 = vadd.f32 %v3513_v25, %v1734_v24 }
 0x523   : > { %v1827_v29 = vadd.f32 %v1826_v26, %v1734_v24  ;;  %v2259_v26 = vld [vmem:[%s5409_s22 + $0x40] sm:$0xff] }
 0x524   : > { %v1866_v32 = vmul.f32 0.2, %v1832_v27 }
 0x525   : > { %v1865_v30 = vmul.f32 0.2, %v1827_v29  ;;  %v3516_v17 = vpop.f32.mrb[34].mxu0 }
 0x526   : > { %v1836_v31 = vpop.f32.mrb[35].mxu0  ;;  %v1874_v40 = vmax.f32 %v1832_v27, %v1866_v32  ;;  %v1842_v42 = vadd.f32 %v3516_v17, %v1734_v24  ;;  %v2260_v27 = vld [vmem:[%s5409_s22 + $0x48] sm:$0xff]  ;;  %v1932_v17 = vpop.permute.xlu0 %1931 }
 0x527   : > { %v1873_v33 = vmax.f32 %v1827_v29, %v1865_v30  ;;  %v1837_v34 = vadd.f32 %v1836_v31, %v1734_v24  ;;  %v3875_v29 = vpack.c.bf16 %v2260_v27, %v2259_v26  ;;  %v1930_v30 = vpop.permute.xlu1 %1929 }
 0x528   : > { %v1868_v46 = vmul.f32 0.2, %v1842_v42 }
 0x529   : > { %v3519_v35 = vpop.f32.mrb[36].mxu0  ;;  %2002 = vmatmul.mubr.f32.vlgmr.msra.gmra.mrb[32].mxu1 %v1873_v33  ;;  %v1867_v43 = vmul.f32 0.2, %v1837_v34 }
 0x52a   : > { %v1846_v36 = vpop.f32.mrb[37].mxu0  ;;  %2007 = vmatprep.mubr.f32.mxu1 %v4238_v48  ;;  %v1876_v50 = vmax.f32 %v1842_v42, %v1868_v46  ;;  %v1852_v5 = vadd.f32 %v3519_v35, %v1734_v24  ;;  %3862 = vmatpush3.bf16.msra.mxu1 %v3859_v11 }
 0x52b   : > { %v1875_v47 = vmax.f32 %v1837_v34, %v1867_v43  ;;  %v1847_v28 = vadd.f32 %v1846_v36, %v1734_v24  ;;  %3864 = vmatprep.subr.bf16.mxu1 %v3863_v37  ;;  %v1928_v31 = vpop.permute.xlu1 %1927  ;;  %v5191_v34 = vsel %vm900_vm2, %v1930_v30, %v1932_v17 }
 0x52c   : > { %v1870_v39 = vmul.f32 0.2, %v1852_v5  ;;  %v5188_v32 = vsel %vm900_vm2, %v1928_v31, %v1930_v30 }
 0x52d   : > { %v3522_v44 = vpop.f32.mrb[38].mxu0  ;;  %2008 = vmatmul.mubr.f32.gmra.mrb[34].mxu1 %v1874_v40  ;;  %v1869_v49 = vmul.f32 0.2, %v1847_v28 }
 0x52e   : > { %v1856_v45 = vpop.f32.mrb[39].mxu0  ;;  %2013 = vmatprep.mubr.f32.mxu1 %v4238_v48  ;;  %v1878_v52 = vmax.f32 %v1852_v5, %v1870_v39  ;;  %v1862_v53 = vadd.f32 %v3522_v44, %v1734_v24  ;;  %3866 = vmatpush3.bf16.msra.mxu1 %v3863_v37 }
 0x52f   : > { %v1877_v51 = vmax.f32 %v1847_v28, %v1869_v49  ;;  %v1857_v41 = vadd.f32 %v1856_v45, %v1734_v24  ;;  %v2258_v24 = vld [vmem:[%s5409_s22 + $0x38] sm:$0xff]  ;;  %3868 = vmatprep.subr.bf16.mxu1 %v3867_v21 }
 0x530   : > { %v1872_v55 = vmul.f32 0.2, %v1862_v53  ;;  %v3871_v25 = vpack.c.bf16 %v2258_v24, %v2257_v23 }
 0x531   : > { %2014 = vmatmul.mubr.f32.gmra.mrb[36].mxu1 %v1875_v47  ;;  %v1871_v54 = vmul.f32 0.2, %v1857_v41 }
 0x532   : > { %2019 = vmatprep.mubr.f32.mxu1 %v4238_v48  ;;  %v1880_v57 = vmax.f32 %v1862_v53, %v1872_v55  ;;  %3870 = vmatpush3.bf16.msra.mxu1 %v3867_v21 }
 0x533   : > { %v1879_v56 = vmax.f32 %v1857_v41, %v1871_v54  ;;  %3872 = vmatprep.subr.bf16.mxu1 %v3871_v25 }
 0x535   : > { %2020 = vmatmul.mubr.f32.gmra.mrb[38].mxu1 %v1876_v50 }
 0x536   : > { %2025 = vmatprep.mubr.f32.mxu1 %v4238_v48  ;;  %3874 = vmatpush3.bf16.msra.mxu1 %v3871_v25 }
 0x537   : > { %3876 = vmatprep.subr.bf16.mxu1 %v3875_v29 }
 0x539   : > { %2026 = vmatmul.mubr.f32.gmra.mrb[40].mxu1 %v1877_v51 }
 0x53a   : > { %2031 = vmatprep.mubr.f32.mxu1 %v4238_v48  ;;  %3878 = vmatpush3.bf16.msra.mxu1 %v3875_v29 }
 0x53d   : > { %2032 = vmatmul.mubr.f32.gmra.mrb[42].mxu1 %v1878_v52 }
 0x53e   : > { %2037 = vmatprep.mubr.f32.mxu1 %v4238_v48 }
 0x541   : > { %2038 = vmatmul.mubr.f32.gmra.mrb[44].mxu1 %v1879_v56 }
 0x542   : > { %2043 = vmatprep.mubr.f32.mxu1 %v4238_v48  ;;  %v3853_v48 = vpack.c.bf16 %v2095_v62, %v2094_v61 }
 0x544   : > { %3854 = vmatpush3.bf16.msra.mxu0 %v3853_v48 }
 0x545   : > { %2044 = vmatmul.mubr.f32.gmra.mrb[46].mxu1 %v1880_v57  ;;  %3856 = vmatprep.subr.bf16.mxu0 %v3855_v1 }
 0x548   : > { %3858 = vmatpush3.bf16.msra.mxu0 %v3857_v4 }
 0x5fc   : > { %v2003_v33 = vpop.f32.mrb[32].mxu1 }
 0x5fd   : > { %v2004_v35 = vadd.f32 %v2003_v33, %v5188_v32  ;;  %v2005_v36 = vpop.f32.mrb[33].mxu1 }
 0x5fe   : > { %v2006_v40 = vadd.f32 %v2005_v36, %v5191_v34 }
 0x5ff   : > { %v2050_v42 = vmul.f32 0.2, %v2004_v35 }
 0x600   : > { %v2051_v43 = vmul.f32 0.2, %v2006_v40  ;;  %v2009_v44 = vpop.f32.mrb[34].mxu1 }
 0x601   : > { %v2010_v45 = vadd.f32 %v2009_v44, %v5188_v32  ;;  %v2011_v46 = vpop.f32.mrb[35].mxu1  ;;  %v2066_v50 = vmax.f32 %v2004_v35, %v2050_v42 }
 0x602   : > { %v2067_v47 = vmax.f32 %v2006_v40, %v2051_v43  ;;  %v2012_v28 = vadd.f32 %v2011_v46, %v5191_v34 }
 0x603   : > { %v2052_v5 = vmul.f32 0.2, %v2010_v45 }
 0x604   : > { %v2053_v49 = vmul.f32 0.2, %v2012_v28  ;;  %v2015_v39 = vpop.f32.mrb[36].mxu1  ;;  %2194 = vmatprep.mubr.f32.mxu0 %v2067_v47 }
 0x605   : > { %v2016_v51 = vadd.f32 %v2015_v39, %v5188_v32  ;;  %v2017_v41 = vpop.f32.mrb[37].mxu1  ;;  %2195 = vmatmul.mubr.f32.vlgmr.msra.gmra.mrb[40].mxu0 %v2066_v50  ;;  %v2068_v54 = vmax.f32 %v2010_v45, %v2052_v5  ;;  %v2264_v5 = vld [vmem:[%s5409_s22 + $0x68] sm:$0xff]  ;;  %v2265_v39 = vld [vmem:[%s5409_s22 + $0x70] sm:$0xff] }
 0x606   : > { %v2069_v52 = vmax.f32 %v2012_v28, %v2053_v49  ;;  %v2018_v53 = vadd.f32 %v2017_v41, %v5191_v34  ;;  %v2261_v28 = vld [vmem:[%s5409_s22 + $0x50] sm:$0xff] }
 0x607   : > { %v2054_v55 = vmul.f32 0.2, %v2016_v51 }
 0x608   : > { %v2055_v56 = vmul.f32 0.2, %v2018_v53  ;;  %v2021_v57 = vpop.f32.mrb[38].mxu1  ;;  %2199 = vmatprep.mubr.f32.mxu0 %v2069_v52  ;;  %v3107_v52 = vld [vmem:[%s5367_s13 + $0x4] ss:$0 sm:$0xff] }
 0x609   : > { %v2022_v58 = vadd.f32 %v2021_v57, %v5188_v32  ;;  %v2023_v59 = vpop.f32.mrb[39].mxu1  ;;  %2200 = vmatmul.mubr.f32.gmra.mrb[42].mxu0 %v2068_v54  ;;  %v2070_v62 = vmax.f32 %v2016_v51, %v2054_v55  ;;  %v2266_v51 = vld [vmem:[%s5409_s22 + $0x78] sm:$0xff]  ;;  %2273 = vrot.lane.b32.xlu0 %v3107_v52, %s4237_s21  ;;  %v2392_v57 = vld [vmem:[#allocation10 + $0x18] sm:$0xff] }
 0x60a   : > { %v2071_v60 = vmax.f32 %v2018_v53, %v2055_v56  ;;  %v2024_v61 = vadd.f32 %v2023_v59, %v5191_v34  ;;  %v3887_v41 = vpack.c.bf16 %v2266_v51, %v2265_v39  ;;  %v2389_v53 = vld [vmem:[#allocation10] sm:$0xff]  ;;  %v2390_v54 = vld [vmem:[#allocation10 + $0x8] sm:$0xff]  ;;  %v2391_v56 = vld [vmem:[#allocation10 + $0x10] sm:$0xff] }
 0x60b   : > { %v2056_v48 = vmul.f32 0.2, %v2022_v58  ;;  %v3891_v55 = vpack.c.bf16 %v2390_v54, %v2389_v53  ;;  %v2393_v59 = vld [vmem:[#allocation10 + $0x20] sm:$0xff] }
 0x60c   : > { %v2057_v63 = vmul.f32 0.2, %v2024_v61  ;;  %v2027_v0 = vpop.f32.mrb[40].mxu1  ;;  %2204 = vmatprep.mubr.f32.mxu0 %v2071_v60  ;;  %v2394_v60 = vld [vmem:[#allocation10 + $0x28] sm:$0xff] }
 0x60d   : > { %v2028_v1 = vadd.f32 %v2027_v0, %v5188_v32  ;;  %v2029_v2 = vpop.f32.mrb[41].mxu1  ;;  %2205 = vmatmul.mubr.f32.gmra.mrb[44].mxu0 %v2070_v62  ;;  %v2072_v6 = vmax.f32 %v2022_v58, %v2056_v48  ;;  %v3895_v58 = vpack.c.bf16 %v2392_v57, %v2391_v56  ;;  %3892 = vmatprep.subr.bf16.mxu0 %v3891_v55  ;;  %v2125_v62 = vpop.permute.xlu0 %2124  ;;  %v2395_v57 = vld [vmem:[#allocation10 + $0x30] sm:$0xff] }
 0x60e   : > { %v2073_v3 = vmax.f32 %v2024_v61, %v2057_v63  ;;  %v2030_v4 = vadd.f32 %v2029_v2, %v5191_v34  ;;  %3894 = vmatpush3.bf16.msra.mxu0 %v3891_v55  ;;  %v3899_v61 = vpack.c.bf16 %v2394_v60, %v2393_v59  ;;  %v2127_v48 = vpop.permute.xlu1 %2126  ;;  %v2381_v60 = vld [vmem:[#allocation9] sm:$0xff] }
 0x60f   : > { %v2058_v7 = vmul.f32 0.2, %v2028_v1  ;;  %3896 = vmatprep.subr.bf16.mxu0 %v3895_v58 }
 0x610   : > { %v2059_v8 = vmul.f32 0.2, %v2030_v4  ;;  %v2033_v9 = vpop.f32.mrb[42].mxu1  ;;  %2209 = vmatprep.mubr.f32.mxu0 %v2073_v3 }
 0x611   : > { %v2034_v11 = vadd.f32 %v2033_v9, %v5188_v32  ;;  %v2035_v12 = vpop.f32.mrb[43].mxu1  ;;  %2210 = vmatmul.mubr.f32.gmra.mrb[46].mxu0 %v2072_v6  ;;  %v2074_v13 = vmax.f32 %v2028_v1, %v2058_v7  ;;  %v2128_v1 = vsel %vm900_vm2, %v2125_v62, %v2127_v48  ;;  %v2686_v48 = vld [vmem:[%s5410_s25] sm:$0xff] }
 0x612   : > { %v2075_v37 = vmax.f32 %v2030_v4, %v2059_v8  ;;  %v2036_v10 = vadd.f32 %v2035_v12, %v5191_v34  ;;  %3898 = vmatpush3.bf16.msra.mxu0 %v3895_v58  ;;  %v2396_v58 = vld [vmem:[#allocation10 + $0x38] sm:$0xff] }
 0x613   : > { %v2060_v21 = vmul.f32 0.2, %v2034_v11  ;;  %3900 = vmatprep.subr.bf16.mxu0 %v3899_v61  ;;  %v3903_v59 = vpack.c.bf16 %v2396_v58, %v2395_v57  ;;  %v3124_v58 = vld [vmem:[%s5411_s27] ss:$0 sm:$0xff] }
 0x614   : > { %v2061_v23 = vmul.f32 0.2, %v2036_v10  ;;  %v2039_v24 = vpop.f32.mrb[44].mxu1  ;;  %2214 = vmatprep.mubr.f32.mxu0 %v2075_v37 }
 0x615   : > { %v2040_v25 = vadd.f32 %v2039_v24, %v5188_v32  ;;  %v2041_v26 = vpop.f32.mrb[45].mxu1  ;;  %2215 = vmatmul.mubr.f32.gmra.mrb[48].mxu0 %v2074_v13  ;;  %v2076_v30 = vmax.f32 %v2034_v11, %v2060_v21 }
 0x616   : > { %v2077_v27 = vmax.f32 %v2036_v10, %v2061_v23  ;;  %v2042_v29 = vadd.f32 %v2041_v26, %v5191_v34  ;;  %3902 = vmatpush3.bf16.msra.mxu0 %v3899_v61  ;;  %v2382_v61 = vld [vmem:[#allocation9 + $0x8] sm:$0xff] }
 0x617   : > { %v2062_v17 = vmul.f32 0.2, %v2040_v25  ;;  %3904 = vmatprep.subr.bf16.mxu0 %v3903_v59  ;;  %v3907_v62 = vpack.c.bf16 %v2382_v61, %v2381_v60 }
 0x618   : > { %v2063_v31 = vmul.f32 0.2, %v2042_v29  ;;  %v2045_v33 = vpop.f32.mrb[46].mxu1  ;;  %2219 = vmatprep.mubr.f32.mxu0 %v2077_v27 }
 0x619   : > { %v2046_v35 = vadd.f32 %v2045_v33, %v5188_v32  ;;  %v2047_v36 = vpop.f32.mrb[47].mxu1  ;;  %2220 = vmatmul.mubr.f32.gmra.mrb[50].mxu0 %v2076_v30  ;;  %v2078_v43 = vmax.f32 %v2040_v25, %v2062_v17  ;;  %v2262_v32 = vld [vmem:[%s5409_s22 + $0x58] sm:$0xff] }
 0x61a   : > { %v2079_v40 = vmax.f32 %v2042_v29, %v2063_v31  ;;  %v2048_v42 = vadd.f32 %v2047_v36, %v5191_v34  ;;  %v3879_v50 = vpack.c.bf16 %v2262_v32, %v2261_v28  ;;  %v2263_v34 = vld [vmem:[%s5409_s22 + $0x60] sm:$0xff]  ;;  %3906 = vmatpush3.bf16.msra.mxu0 %v3903_v59 }
 0x61b   : > { %v2064_v44 = vmul.f32 0.2, %v2046_v35  ;;  %v3883_v49 = vpack.c.bf16 %v2264_v5, %v2263_v34  ;;  %3908 = vmatprep.subr.bf16.mxu0 %v3907_v62 }
 0x61c   : > { %v2065_v45 = vmul.f32 0.2, %v2048_v42  ;;  %2224 = vmatprep.mubr.f32.mxu0 %v2079_v40  ;;  %3880 = vmatprep.subr.bf16.mxu1 %v3879_v50 }
 0x61d   : > { %2225 = vmatmul.mubr.f32.gmra.mrb[52].mxu0 %v2078_v43  ;;  %v2080_v47 = vmax.f32 %v2046_v35, %v2064_v44  ;;  %3882 = vmatpush3.bf16.msra.mxu1 %v3879_v50 }
 0x61e   : > { %v2081_v46 = vmax.f32 %v2048_v42, %v2065_v45  ;;  %3884 = vmatprep.subr.bf16.mxu1 %v3883_v49 }
 0x620   : > { %2229 = vmatprep.mubr.f32.mxu0 %v2081_v46 }
 0x621   : > { %2230 = vmatmul.mubr.f32.gmra.mrb[54].mxu0 %v2080_v47  ;;  %3886 = vmatpush3.bf16.msra.mxu1 %v3883_v49 }
 0x622   : > { %3888 = vmatprep.subr.bf16.mxu1 %v3887_v41 }
 0x625   : > { %3890 = vmatpush3.bf16.msra.mxu1 %v3887_v41 }
 0x6d8   : > { %v3291_v63 = vpop.f32.mrb[40].mxu0 }
 0x6d9   : > { %v3292_v0 = vpop.f32.mrb[41].mxu0 }
 0x6da   : > { %v3293_v2 = vadd.f32 %v3292_v0, %v3291_v63  ;;  %v2687_v63 = vld [vmem:[%s5410_s25 + $0x8] sm:$0xff]  ;;  %v2688_v0 = vld [vmem:[%s5410_s25 + $0x10] sm:$0xff] }
 0x6dc   : > { %v3294_v3 = vpop.f32.mrb[42].mxu0  ;;  %v2197_v4 = vadd.f32 %v3293_v2, %v2128_v1  ;;  %v2689_v2 = vld [vmem:[%s5410_s25 + $0x18] sm:$0xff] }
 0x6dd   : > { %v3295_v6 = vpop.f32.mrb[43].mxu0 }
 0x6de   : > { %v3296_v7 = vadd.f32 %v3295_v6, %v3294_v3  ;;  %v2235_v8 = vmul.f32 0.2, %v2197_v4  ;;  %v3927_v3 = vpack.c.bf16 %v2689_v2, %v2688_v0  ;;  %v2691_v6 = vld [vmem:[%s5410_s25 + $0x28] sm:$0xff] }
 0x6e0   : > { %v2202_v9 = vadd.f32 %v3296_v7, %v2128_v1  ;;  %v3297_v11 = vpop.f32.mrb[44].mxu0  ;;  %v2243_v12 = vmax.f32 %v2197_v4, %v2235_v8  ;;  %v2690_v4 = vld [vmem:[%s5410_s25 + $0x20] sm:$0xff]  ;;  %v2692_v8 = vld [vmem:[%s5410_s25 + $0x30] sm:$0xff] }
 0x6e1   : > { %v3298_v37 = vpop.f32.mrb[45].mxu0  ;;  %v3931_v7 = vpack.c.bf16 %v2691_v6, %v2690_v4 }
 0x6e2   : > { %v2236_v10 = vmul.f32 0.2, %v2202_v9  ;;  %v3299_v13 = vadd.f32 %v3298_v37, %v3297_v11  ;;  %3555 = vmatprep.mubr.f32.mxu1 %v2243_v12  ;;  %v2694_v12 = vld [vmem:[%s5410_s25 + $0x40] sm:$0xff]  ;;  %v2695_v37 = vld [vmem:[%s5410_s25 + $0x48] sm:$0xff] }
 0x6e4   : > { %v2244_v21 = vmax.f32 %v2202_v9, %v2236_v10  ;;  %v2207_v23 = vadd.f32 %v3299_v13, %v2128_v1  ;;  %v3300_v24 = vpop.f32.mrb[46].mxu0  ;;  %v2693_v9 = vld [vmem:[%s5410_s25 + $0x38] sm:$0xff]  ;;  %v3939_v10 = vpack.c.bf16 %v2695_v37, %v2694_v12  ;;  %v2696_v13 = vld [vmem:[%s5410_s25 + $0x50] sm:$0xff] }
 0x6e5   : > { %v3301_v25 = vpop.f32.mrb[47].mxu0  ;;  %v3935_v11 = vpack.c.bf16 %v2693_v9, %v2692_v8 }
 0x6e6   : > { %v2237_v26 = vmul.f32 0.2, %v2207_v23  ;;  %v3302_v27 = vadd.f32 %v3301_v25, %v3300_v24  ;;  %3556 = vmatmul.mubr.f32.vlgmr.msra.gmra.mrb[48].mxu1 %v2244_v21  ;;  %v2697_v21 = vld [vmem:[%s5410_s25 + $0x58] sm:$0xff]  ;;  %v2274_v24 = vpop.permute.xlu0 %2273 }
 0x6e8   : > { %v2212_v29 = vadd.f32 %v3302_v27, %v2128_v1  ;;  %v3303_v30 = vpop.f32.mrb[48].mxu0  ;;  %v2245_v17 = vmax.f32 %v2207_v23, %v2237_v26  ;;  %v3943_v23 = vpack.c.bf16 %v2697_v21, %v2696_v13  ;;  %v2383_v26 = vld [vmem:[#allocation9 + $0x10] sm:$0xff]  ;;  %v2384_v27 = vld [vmem:[#allocation9 + $0x18] sm:$0xff] }
 0x6e9   : > { %v3304_v31 = vpop.f32.mrb[49].mxu0 }
 0x6ea   : > { %v2238_v33 = vmul.f32 0.2, %v2212_v29  ;;  %v3305_v35 = vadd.f32 %v3304_v31, %v3303_v30  ;;  %3558 = vmatprep.mubr.f32.mxu1 %v2245_v17  ;;  %v3911_v31 = vpack.c.bf16 %v2384_v27, %v2383_v26 }
 0x6ec   : > { %v2217_v36 = vadd.f32 %v3305_v35, %v2128_v1  ;;  %v3306_v40 = vpop.f32.mrb[50].mxu0  ;;  %v2246_v42 = vmax.f32 %v2212_v29, %v2238_v33  ;;  %v2385_v33 = vld [vmem:[#allocation9 + $0x20] sm:$0xff]  ;;  %v2386_v35 = vld [vmem:[#allocation9 + $0x28] sm:$0xff] }
 0x6ed   : > { %v3307_v43 = vpop.f32.mrb[51].mxu0 }
 0x6ee   : > { %v2239_v44 = vmul.f32 0.2, %v2217_v36  ;;  %v3308_v45 = vadd.f32 %v3307_v43, %v3306_v40  ;;  %3559 = vmatmul.mubr.f32.gmra.mrb[50].mxu1 %v2246_v42  ;;  %v2387_v42 = vld [vmem:[#allocation9 + $0x30] sm:$0xff]  ;;  %v2388_v43 = vld [vmem:[#allocation9 + $0x38] sm:$0xff] }
 0x6f0   : > { %v2222_v46 = vadd.f32 %v3308_v45, %v2128_v1  ;;  %v3309_v47 = vpop.f32.mrb[52].mxu0  ;;  %v2247_v28 = vmax.f32 %v2217_v36, %v2239_v44  ;;  %v3915_v36 = vpack.c.bf16 %v2386_v35, %v2385_v33 }
 0x6f1   : > { %v3310_v32 = vpop.f32.mrb[53].mxu0 }
 0x6f2   : > { %v2240_v50 = vmul.f32 0.2, %v2222_v46  ;;  %v3311_v34 = vadd.f32 %v3310_v32, %v3309_v47  ;;  %3561 = vmatprep.mubr.f32.mxu1 %v2247_v28  ;;  %v3919_v47 = vpack.c.bf16 %v2388_v43, %v2387_v42 }
 0x6f4   : > { %v2227_v5 = vadd.f32 %v3311_v34, %v2128_v1  ;;  %v3312_v49 = vpop.f32.mrb[54].mxu0  ;;  %v2248_v39 = vmax.f32 %v2222_v46, %v2240_v50 }
 0x6f5   : > { %v3313_v51 = vpop.f32.mrb[55].mxu0 }
 0x6f6   : > { %v2241_v41 = vmul.f32 0.2, %v2227_v5  ;;  %v3314_v52 = vadd.f32 %v3313_v51, %v3312_v49  ;;  %3562 = vmatmul.mubr.f32.gmra.mrb[52].mxu1 %v2248_v39  ;;  %v1441_v49 = vpop.permute.xlu1 %1440 }
 0x6f7   : > { %v1540_v57 = vadd.f32 %v5120_v22, %v1441_v49 }
 0x6f8   : > { %v2232_v53 = vadd.f32 %v3314_v52, %v2128_v1  ;;  %v2249_v54 = vmax.f32 %v2227_v5, %v2241_v41  ;;  %v3923_v1 = vpack.c.bf16 %v2687_v63, %v2686_v48  ;;  %v1510_v52 = vadd.f32 %v5108_v15, %v1441_v49 }
 0x6f9   : > { %v1535_v15 = vadd.f32 %v5114_v19, %v1441_v49  ;;  %v2700_v19 = vld [vmem:[%s5410_s25 + $0x70] sm:$0xff] }
 0x6fa   : > { %v2242_v55 = vmul.f32 0.2, %v2232_v53  ;;  %3564 = vmatprep.mubr.f32.mxu1 %v2249_v54  ;;  %3924 = vmatprep.subr.bf16.mxu1 %v3923_v1  ;;  %v1520_v54 = vadd.f32 %v5112_v18, %v1441_v49  ;;  %v2699_v18 = vld [vmem:[%s5410_s25 + $0x68] sm:$0xff] }
 0x6fb   : > { %3926 = vmatpush3.bf16.msra.mxu1 %v3923_v1 }
 0x6fc   : > { %v2250_v56 = vmax.f32 %v2232_v53, %v2242_v55  ;;  %3928 = vmatprep.subr.bf16.mxu1 %v3927_v3  ;;  %v1515_v53 = vadd.f32 %v5106_v14, %v1441_v49  ;;  %v1525_v55 = vadd.f32 %v5110_v16, %v1441_v49  ;;  %v1545_v14 = vadd.f32 %v5118_v38, %v1441_v49  ;;  %v2698_v16 = vld [vmem:[%s5410_s25 + $0x60] sm:$0xff]  ;;  %v2701_v38 = vld [vmem:[%s5410_s25 + $0x78] sm:$0xff] }
 0x6fd   : > { %v3951_v22 = vpack.c.bf16 %v2701_v38, %v2700_v19 }
 0x6fe   : > { %3565 = vmatmul.mubr.f32.gmra.mrb[54].mxu1 %v2250_v56  ;;  %v1530_v56 = vadd.f32 %v5116_v20, %v1441_v49  ;;  %v3947_v20 = vpack.c.bf16 %v2699_v18, %v2698_v16 }
 0x6ff   : > { %3930 = vmatpush3.bf16.msra.mxu1 %v3927_v3 }
 0x700   : > { %3932 = vmatprep.subr.bf16.mxu1 %v3931_v7 }
 0x703   : > { %3934 = vmatpush3.bf16.msra.mxu1 %v3931_v7 }
 0x704   : > { %3936 = vmatprep.subr.bf16.mxu1 %v3935_v11 }
 0x707   : > { %3938 = vmatpush3.bf16.msra.mxu1 %v3935_v11 }
 0x708   : > { %3940 = vmatprep.subr.bf16.mxu1 %v3939_v10 }
 0x70b   : > { %3942 = vmatpush3.bf16.msra.mxu1 %v3939_v10 }
 0x70c   : > { %3944 = vmatprep.subr.bf16.mxu1 %v3943_v23 }
 0x70f   : > { %3946 = vmatpush3.bf16.msra.mxu1 %v3943_v23 }
 0x710   : > { %3948 = vmatprep.subr.bf16.mxu1 %v3947_v20 }
 0x713   : > { %3950 = vmatpush3.bf16.msra.mxu1 %v3947_v20 }
 0x714   : > { %3952 = vmatprep.subr.bf16.mxu1 %v3951_v22 }
 0x717   : > { %3954 = vmatpush3.bf16.msra.mxu1 %v3951_v22 }
 0x7b9   : > { %v3557_v25 = vpop.f32.mrb[48].mxu1 }
 0x7ba   : > { %v2342_v29 = vpop.f32.mrb[49].mxu1  ;;  %v2348_v17 = vadd.f32 %v3557_v25, %v2274_v24 }
 0x7bb   : > { %v2343_v30 = vadd.f32 %v2342_v29, %v2274_v24 }
 0x7bd   : > { %3583 = vmatprep.mubr.msk.f32.mxu0 %vm900_vm2, %v2343_v30 }
 0x7be   : > { %3584 = vmatmul.mubr.msk.f32.vlgmr.msra.gmra.mrb[56].mxu0 %vm900_vm2, %v2348_v17 }
 0x7bf   : > { %3910 = vmatpush3.bf16.msra.mxu0 %v3907_v62 }
 0x7c0   : > { %3912 = vmatprep.subr.bf16.mxu0 %v3911_v31 }
 0x7c1   : > { %v3560_v40 = vpop.f32.mrb[50].mxu1 }
 0x7c2   : > { %v2352_v44 = vpop.f32.mrb[51].mxu1  ;;  %v2358_v46 = vadd.f32 %v3560_v40, %v2274_v24 }
 0x7c3   : > { %v2353_v45 = vadd.f32 %v2352_v44, %v2274_v24  ;;  %3914 = vmatpush3.bf16.msra.mxu0 %v3911_v31 }
 0x7c4   : > { %3916 = vmatprep.subr.bf16.mxu0 %v3915_v36 }
 0x7c5   : > { %3586 = vmatprep.mubr.msk.f32.mxu0 %vm900_vm2, %v2353_v45 }
 0x7c6   : > { %3587 = vmatmul.mubr.msk.f32.gmra.mrb[58].mxu0 %vm900_vm2, %v2358_v46 }
 0x7c7   : > { %3918 = vmatpush3.bf16.msra.mxu0 %v3915_v36  ;;  %v5310_v36 = vld [vmem:[%s5411_s27 + $0x1] ss:$0 sm:$0xff] }
 0x7c8   : > { %3920 = vmatprep.subr.bf16.mxu0 %v3919_v47 }
 0x7c9   : > { %v3563_v28 = vpop.f32.mrb[52].mxu1 }
 0x7ca   : > { %v2362_v32 = vpop.f32.mrb[53].mxu1  ;;  %v2368_v34 = vadd.f32 %v3563_v28, %v2274_v24  ;;  %v3126_v28 = vld [vmem:[%s5412_s11] ss:$0 sm:$0xff] }
 0x7cb   : > { %v2363_v50 = vadd.f32 %v2362_v32, %v2274_v24  ;;  %3922 = vmatpush3.bf16.msra.mxu0 %v3919_v47 }
 0x7cd   : > { %3589 = vmatprep.mubr.msk.f32.mxu0 %vm900_vm2, %v2363_v50 }
 0x7ce   : > { %3590 = vmatmul.mubr.msk.f32.gmra.mrb[60].mxu0 %vm900_vm2, %v2368_v34 }
 0x7d1   : > { %v3566_v5 = vpop.f32.mrb[54].mxu1 }
 0x7d2   : > { %v2372_v39 = vpop.f32.mrb[55].mxu1  ;;  %v2378_v41 = vadd.f32 %v3566_v5, %v2274_v24 }
 0x7d3   : > { %v2373_v51 = vadd.f32 %v2372_v39, %v2274_v24 }
 0x7d5   : > { %3592 = vmatprep.mubr.msk.f32.mxu0 %vm900_vm2, %v2373_v51 }
 0x7d6   : > { %3593 = vmatmul.mubr.msk.f32.gmra.mrb[62].mxu0 %vm900_vm2, %v2378_v41 }
 0x7d7   : > { %3611 = vmatprep.mubr.msk.f32.mxu0 %vm900_vm2, %v1510_v52 }
 0x7da   : > { %3612 = vmatmul.mubr.msk.f32.vlgmr.msra.gmra.mrb[56].mxu0 %vm900_vm2, %v1515_v53 }
 0x7db   : > { %3614 = vmatprep.mubr.msk.f32.mxu0 %vm900_vm2, %v1520_v54 }
 0x7de   : > { %3615 = vmatmul.mubr.msk.f32.gmra.mrb[58].mxu0 %vm900_vm2, %v1525_v55 }
 0x7df   : > { %3617 = vmatprep.mubr.msk.f32.mxu0 %vm900_vm2, %v1530_v56 }
 0x7e2   : > { %3618 = vmatmul.mubr.msk.f32.gmra.mrb[60].mxu0 %vm900_vm2, %v1535_v15 }
 0x7e3   : > { %3620 = vmatprep.mubr.msk.f32.mxu0 %vm900_vm2, %v1540_v57 }
 0x7e6   : > { %3621 = vmatmul.mubr.msk.f32.gmra.mrb[62].mxu0 %vm900_vm2, %v1545_v14 }
 0x8ad   : > { %v3613_v59 = vpop.f32.mrb[56].mxu0 }
 0x8ae   : > { %v2663_v60 = vadd.f32 %v3613_v59, %v3124_v58  ;;  %v2616_v61 = vpop.f32.mrb[57].mxu0 }
 0x8af   : > { %v2662_v62 = vadd.f32 %v3124_v58, %v2616_v61 }
 0x8b0   : > { %v2671_v48 = vmul.f32 0.2, %v2663_v60 }
 0x8b1   : > { %v2670_v63 = vmul.f32 0.2, %v2662_v62  ;;  %v3616_v0 = vpop.f32.mrb[58].mxu0 }
 0x8b2   : > { %v2665_v1 = vadd.f32 %v3616_v0, %v3124_v58  ;;  %v2626_v2 = vpop.f32.mrb[59].mxu0  ;;  %v2679_v6 = vmax.f32 %v2663_v60, %v2671_v48 }
 0x8b3   : > { %v2678_v3 = vmax.f32 %v2662_v62, %v2670_v63  ;;  %v2664_v4 = vadd.f32 %v3124_v58, %v2626_v2 }
 0x8b4   : > { %v2673_v7 = vmul.f32 0.2, %v2665_v1 }
 0x8b5   : > { %v2672_v8 = vmul.f32 0.2, %v2664_v4  ;;  %v3619_v9 = vpop.f32.mrb[60].mxu0  ;;  %3655 = vmatprep.mubr.f32.mxu1 %v2678_v3 }
 0x8b6   : > { %v2667_v11 = vadd.f32 %v3619_v9, %v3124_v58  ;;  %v2636_v12 = vpop.f32.mrb[61].mxu0  ;;  %3656 = vmatmul.mubr.f32.vlgmr.msra.gmra.mrb[56].mxu1 %v2679_v6  ;;  %v2681_v13 = vmax.f32 %v2665_v1, %v2673_v7 }
 0x8b7   : > { %v2680_v37 = vmax.f32 %v2664_v4, %v2672_v8  ;;  %v2666_v10 = vadd.f32 %v3124_v58, %v2636_v12 }
 0x8b8   : > { %v2675_v21 = vmul.f32 0.2, %v2667_v11 }
 0x8b9   : > { %v2674_v23 = vmul.f32 0.2, %v2666_v10  ;;  %v3622_v24 = vpop.f32.mrb[62].mxu0  ;;  %3658 = vmatprep.mubr.f32.mxu1 %v2680_v37 }
 0x8ba   : > { %v2669_v25 = vadd.f32 %v3622_v24, %v3124_v58  ;;  %v2646_v26 = vpop.f32.mrb[63].mxu0  ;;  %3659 = vmatmul.mubr.f32.gmra.mrb[58].mxu1 %v2681_v13  ;;  %v2683_v30 = vmax.f32 %v2667_v11, %v2675_v21 }
 0x8bb   : > { %v2682_v27 = vmax.f32 %v2666_v10, %v2674_v23  ;;  %v2668_v29 = vadd.f32 %v3124_v58, %v2646_v26 }
 0x8bc   : > { %v2677_v17 = vmul.f32 0.2, %v2669_v25 }
 0x8bd   : > { %v2676_v31 = vmul.f32 0.2, %v2668_v29  ;;  %3661 = vmatprep.mubr.f32.mxu1 %v2682_v27 }
 0x8be   : > { %3662 = vmatmul.mubr.f32.gmra.mrb[60].mxu1 %v2683_v30  ;;  %v2685_v35 = vmax.f32 %v2669_v25, %v2677_v17 }
 0x8bf   : > { %v2684_v33 = vmax.f32 %v2668_v29, %v2676_v31 }
 0x8c1   : > { %3664 = vmatprep.mubr.f32.mxu1 %v2684_v33 }
 0x8c2   : > { %3665 = vmatmul.mubr.f32.gmra.mrb[62].mxu1 %v2685_v35 }
 0x989   : > { %v3657_v40 = vpop.f32.mrb[56].mxu1 }
 0x98a   : > { %v2781_v42 = vadd.f32 %v3657_v40, %v5310_v36  ;;  %v2775_v43 = vpop.f32.mrb[57].mxu1 }
 0x98b   : > { %v2776_v44 = vadd.f32 %v5310_v36, %v2775_v43 }
 0x98c   : > { %v2815_v45 = vmul.f32 0.2, %v2781_v42 }
 0x98d   : > { %v2814_v46 = vmul.f32 0.2, %v2776_v44  ;;  %v3660_v47 = vpop.f32.mrb[58].mxu1 }
 0x98e   : > { %v2823_v32 = vmax.f32 %v2781_v42, %v2815_v45  ;;  %v2791_v50 = vadd.f32 %v3660_v47, %v5310_v36  ;;  %v2785_v34 = vpop.f32.mrb[59].mxu1 }
 0x98f   : > { %v2822_v5 = vmax.f32 %v2776_v44, %v2814_v46  ;;  %v2786_v49 = vadd.f32 %v5310_v36, %v2785_v34 }
 0x990   : > { %v2817_v39 = vmul.f32 0.2, %v2791_v50  ;;  %v2838_v51 = vmul.f32 %v3126_v28, %v2823_v32 }
 0x991   : > { %v2816_v41 = vmul.f32 0.2, %v2786_v49  ;;  %v3663_v52 = vpop.f32.mrb[60].mxu1  ;;  %v2837_v53 = vmul.f32 %v3126_v28, %v2822_v5 }
 0x992   : > { %v2825_v54 = vmax.f32 %v2791_v50, %v2817_v39  ;;  %v2801_v55 = vadd.f32 %v3663_v52, %v5310_v36  ;;  %v2795_v56 = vpop.f32.mrb[61].mxu1  ;;  %v2849_v15 = vsel %vm2845_vm3, %v2838_v51, 0.0 }
 0x993   : > { %v2824_v57 = vmax.f32 %v2786_v49, %v2816_v41  ;;  %v2796_v14 = vadd.f32 %v5310_v36, %v2795_v56  ;;  %2850 = vadd.xlane.f32.xlu1 %v2849_v15  ;;  %v2846_v16 = vsel %vm2845_vm3, %v2837_v53, 0.0 }
 0x994   : > { %v2819_v18 = vmul.f32 0.2, %v2801_v55  ;;  %2847 = vadd.xlane.f32.xlu0 %v2846_v16  ;;  %v2840_v20 = vmul.f32 %v3126_v28, %v2825_v54 }
 0x995   : > { %v2818_v19 = vmul.f32 0.2, %v2796_v14  ;;  %v3666_v38 = vpop.f32.mrb[62].mxu1  ;;  %v2839_v60 = vmul.f32 %v3126_v28, %v2824_v57 }
 0x996   : > { %v2811_v22 = vadd.f32 %v3666_v38, %v5310_v36  ;;  %v2805_v58 = vpop.f32.mrb[63].mxu1  ;;  %v2855_v59 = vsel %vm2845_vm3, %v2840_v20, 0.0  ;;  %v2827_v61 = vmax.f32 %v2801_v55, %v2819_v18 }
 0x997   : > { %v2826_v62 = vmax.f32 %v2796_v14, %v2818_v19  ;;  %v2806_v48 = vadd.f32 %v5310_v36, %v2805_v58  ;;  %v2852_v2 = vsel %vm2845_vm3, %v2839_v60, 0.0 }
 0x998   : > { %v2821_v63 = vmul.f32 0.2, %v2811_v22  ;;  %2856 = vadd.xlane.f32.xlu0 %v2855_v59  ;;  %v2842_v7 = vmul.f32 %v3126_v28, %v2827_v61 }
 0x999   : > { %v2820_v0 = vmul.f32 0.2, %v2806_v48  ;;  %v2841_v1 = vmul.f32 %v3126_v28, %v2826_v62 }
 0x99a   : > { %v2829_v3 = vmax.f32 %v2811_v22, %v2821_v63  ;;  %v2861_v9 = vsel %vm2845_vm3, %v2842_v7, 0.0 }
 0x99b   : > { %v2828_v4 = vmax.f32 %v2806_v48, %v2820_v0  ;;  %v2858_v6 = vsel %vm2845_vm3, %v2841_v1, 0.0 }
 0x99c   : > { %2853 = vadd.xlane.f32.xlu0 %v2852_v2  ;;  %2859 = vadd.xlane.f32.xlu1 %v2858_v6  ;;  %v2844_v12 = vmul.f32 %v3126_v28, %v2829_v3 }
 0x99d   : > { %v2843_v8 = vmul.f32 %v3126_v28, %v2828_v4 }
 0x99e   : > { %v2867_v37 = vsel %vm2845_vm3, %v2844_v12, 0.0 }
 0x99f   : > { %v2864_v11 = vsel %vm2845_vm3, %v2843_v8, 0.0 }
 0x9a0   : > { %2862 = vadd.xlane.f32.xlu0 %v2861_v9  ;;  %2865 = vadd.xlane.f32.xlu1 %v2864_v11 }
 0x9a4   : > { %2868 = vadd.xlane.f32.xlu0 %v2867_v37 }
 0xa20   : > { %v2851_v10 = vpop.xlane.xlu1 %2850 }
 0xa21   : > { %v2871_v13 = vadd.f32 %v5310_v36, %v2851_v10  ;;  %v2848_v21 = vpop.xlane.xlu0 %2847 }
 0xa22   : > { %v2870_v23 = vadd.f32 %v5310_v36, %v2848_v21 }
 0xa23   : > { %2888 = vrot.lane.b32.xlu0 %v2871_v13, %s4239_s12 }
 0xa24   : > { %2886 = vrot.lane.b32.xlu1 %v2870_v23, %s4239_s12 }
 0xa25   : > { %v2857_v24 = vpop.xlane.xlu0 %2856 }
 0xa26   : > { %v2873_v25 = vadd.f32 %v5310_v36, %v2857_v24 }
 0xa28   : > { %2892 = vrot.lane.b32.xlu1 %v2873_v25, %s4239_s12 }
 0xa29   : > { %v2854_v26 = vpop.xlane.xlu0 %2853  ;;  %v2860_v27 = vpop.xlane.xlu1 %2859 }
 0xa2a   : > { %v2872_v29 = vadd.f32 %v5310_v36, %v2854_v26  ;;  %v2874_v30 = vadd.f32 %v5310_v36, %v2860_v27 }
 0xa2c   : > { %2894 = vrot.lane.b32.xlu0 %v2874_v30, %s4239_s12  ;;  %2890 = vrot.lane.b32.xlu1 %v2872_v29, %s4239_s12 }
 0xa2d   : > { %v2863_v17 = vpop.xlane.xlu0 %2862  ;;  %v2866_v31 = vpop.xlane.xlu1 %2865 }
 0xa2e   : > { %v2875_v33 = vadd.f32 %v5310_v36, %v2863_v17  ;;  %v2876_v35 = vadd.f32 %v5310_v36, %v2866_v31 }
 0xa30   : > { %2896 = vrot.lane.b32.xlu1 %v2875_v33, %s4239_s12  ;;  %2898 = vrot.lane.b32.xlu0 %v2876_v35, %s4239_s12 }
 0xa31   : > { %v2869_v40 = vpop.xlane.xlu0 %2868 }
 0xa32   : > { %v2877_v42 = vadd.f32 %v5310_v36, %v2869_v40 }
 0xa34   : > { %2900 = vrot.lane.b32.xlu1 %v2877_v42, %s4239_s12 }
 0xa95   : > { %v2889_v43 = vpop.permute.xlu0 %2888 }
 0xa96   : > { %2912 = vst.msk [vmem:[%s710_s26 + $0x8] sm:$0xff] %vm2910_vm4, %v2889_v43  ;;  %v2887_v44 = vpop.permute.xlu1 %2886 }
 0xa97   : > { %2911 = vst.msk [vmem:[%s710_s26] sm:$0xff] %vm2910_vm4, %v2887_v44 }
 0xa9a   : > { %v2893_v45 = vpop.permute.xlu1 %2892 }
 0xa9b   : > { %2914 = vst.msk [vmem:[%s710_s26 + $0x18] sm:$0xff] %vm2910_vm4, %v2893_v45 }
 0xa9e   : > { %v2895_v46 = vpop.permute.xlu0 %2894  ;;  %v2891_v47 = vpop.permute.xlu1 %2890 }
 0xa9f   : > { %2915 = vst.msk [vmem:[%s710_s26 + $0x20] sm:$0xff] %vm2910_vm4, %v2895_v46  ;;  %2913 = vst.msk [vmem:[%s710_s26 + $0x10] sm:$0xff] %vm2910_vm4, %v2891_v47 }
 0xaa2   : > { %v2899_v36 = vpop.permute.xlu0 %2898  ;;  %v2897_v28 = vpop.permute.xlu1 %2896 }
 0xaa3   : > { %2917 = vst.msk [vmem:[%s710_s26 + $0x30] sm:$0xff] %vm2910_vm4, %v2899_v36  ;;  %2916 = vst.msk [vmem:[%s710_s26 + $0x28] sm:$0xff] %vm2910_vm4, %v2897_v28 }
 0xaa6   : > { %v2901_v32 = vpop.permute.xlu1 %2900 }
 0xaa7   : > { %2918 = vst.msk [vmem:[%s710_s26 + $0x38] sm:$0xff] %vm2910_vm4, %v2901_v32 }
 0xaa8 PF: > { %s33_s0 = sadd.s32 1, %s4227_s0  }
 0xaa9   : > { %p30_p3 = scmp.ge.s32.totalorder %s33_s0, 6  }
 0xaab   :  { %32 = sbr.rel (!%p30_p3) target bundleno = 15 (0xf), region = 154 }
 0xab2   :  { %2941 = vsyncpa [#allocation3], 1 }
 0xab3   :  { %2943 = vsyncpa [#allocation3 + $0x1], 1 }
 0xab4   :  { %2944 = vsyncpa [#allocation5], 1 }
 0xab5   :  { %2945 = vsyncpa [#allocation8], 1 }
 0xab6   :  { %2946 = vsyncpa [#allocation11], 1 }

</bundles_post_ra>
